<compile_context>
chip_gen: v7x
topology: tpu7x:2x2x1
jax: 0.10.0
libtpu: 0.0.40
codegen_flags: <defaults>
</compile_context>

<pallas_src>
import functools

import jax
import jax.numpy as jnp
from jax.experimental import pallas as pl
from jax.experimental.pallas import tpu as pltpu


# ----------------------------------------------------------------------------------------
# Kernel
# ----------------------------------------------------------------------------------------
def _law_attn_kernel(q_ref, v_ref, wq_ref, wv_ref, qadd_ref, fcr_ref,
                     ctx_ref, attn_ref, *, s_true, d_true, approx_recip):
    bt, s_pad, d_eff = v_ref.shape
    a = wq_ref.shape[1]
    cdt = wv_ref.dtype                                 # MXU operand dtype (bf16 or f32)

    v3 = v_ref[...]                                    # (bt, S, D+8): value ++ shifted energies
    v_flat = v3.reshape(bt * s_pad, d_eff)             # layout-preserving (s_pad % 8 == 0)

    # Value projection + folded location conv as one big-M MXU matmul (f32 accumulation).
    vp = jnp.dot(v_flat, wv_ref[...], preferred_element_type=jnp.float32)       # (bt*S, A)
    # Query projection; constant-over-seq row = q_proj + attention bias + conv bias.
    qp = jnp.dot(q_ref[...], wq_ref[...], preferred_element_type=jnp.float32)   # (bt, A)
    qconst = qp + qadd_ref[...]                                                  # (bt, A)

    # tanh(q_proj + v_proj + loc_conv + biases): element-wise in f32 (safe on v5e).
    pre = jnp.tanh(vp.reshape(bt, s_pad, a) + qconst[:, None, :])                # (bt, S, A)

    # fc projection to energies, lane-dense (bt, 1, S).
    # (fc bias dropped: softmax is shift-invariant on the smoothing=False path.)
    fc_b = jnp.broadcast_to(fcr_ref[...].reshape(1, 1, a), (bt, 1, a))
    energy = jnp.einsum("bka,bsa->bks", fc_b, pre.astype(cdt),
                        preferred_element_type=jnp.float32)                      # (bt, 1, S)

    if s_pad != s_true:    # mask padded sequence positions before the softmax
        lane = jax.lax.broadcasted_iota(jnp.int32, (bt, 1, s_pad), 2)
        energy = jnp.where(lane < s_true, energy, -1e30)

    # Softmax over the sequence axis (lane-dense rows). Exact reciprocal on the f32 path.
    m = jnp.max(energy, axis=-1, keepdims=True)
    p = jnp.exp(energy - m)
    attn = p * pl.reciprocal(jnp.sum(p, axis=-1, keepdims=True), approx=approx_recip)

    # context = attn @ value on the MXU (original D feature columns only).
    ctx = jnp.einsum("bqs,bsd->bqd", attn.astype(cdt), v3[:, :, :d_true],
                     preferred_element_type=jnp.float32)                         # (bt, 1, D)

    # Sublane/lane-dense stores: (bt, X) blocks -> unmasked stores when bt % 8 == 0.
    attn_ref[...] = attn.reshape(bt, s_pad).astype(attn_ref.dtype)
    ctx_ref[...] = ctx.reshape(bt, d_true).astype(ctx_ref.dtype)


# ----------------------------------------------------------------------------------------
# Generation-aware tiling / VMEM helpers
# ----------------------------------------------------------------------------------------
def _round_up(x, m):
    return -(-x // m) * m


def _physical_vmem_bytes():
    try:
        return int(pltpu.get_tpu_info().vmem_capacity_bytes)
    except Exception:
        return 64 << 20            # conservative default (v7x physical VMEM)


def _num_tensorcores():
    try:
        kind = jax.devices()[0].device_kind.lower()
    except Exception:
        return 1
    return 2 if "v7" in kind else 1     # v7x: 2 TCs/chip; v5e/v6e: 1


def _step_vmem_bytes(bt, *, s_pad, d, d_eff, a, cdt):
    """Rough per-grid-step VMEM working set (pipeline buffers + live intermediates)."""
    ib = jnp.dtype(cdt).itemsize
    io = 2 * (bt * d * ib + bt * s_pad * d_eff * ib       # pipelined inputs (x2 buffers)
              + bt * d * 4 + bt * s_pad * 4)              # pipelined outputs (f32)
    w = 2 * ((d + d_eff) * a * ib + a * ib + a * 4)       # grid-invariant weights (x2 buffers)
    live = (2 * bt * s_pad * a * 4                        # vp / pre f32 intermediates
            + bt * s_pad * a * ib                         # pre cast for the fc matmul
            + bt * s_pad * d_eff * ib                     # value tile live through ctx matmul
            + 4 * bt * s_pad * 4)                         # energy / softmax temporaries
    return io + w + live + (2 << 20)                      # + compiler-internal scratch slack


def _select_batch_tile(b_pad, step_bytes, budget, n_cores):
    """Largest batch tile (multiple of 8, or == b_pad) fitting the VMEM budget; on 2-TC
    chips prefer an even grid length so both TensorCores get work."""
    cands = sorted({b_pad, *[t for t in range(8, b_pad, 8) if b_pad % t == 0]}, reverse=True)
    fits = [t for t in cands if step_bytes(t) <= budget] or [cands[-1]]
    if n_cores >= 2:
        even = [t for t in fits if (b_pad // t) % 2 == 0]
        if even:
            return even[0]          # e.g. bt = b_pad // 2  -> grid == (2,) on v7x
    return fits[0]                  # single TC: fewest grid steps that fit VMEM


# ----------------------------------------------------------------------------------------
# Wrapper
# ----------------------------------------------------------------------------------------
def location_aware_attention(query, value, last_alignment_energy, params, *,
                             compute_dtype=jnp.bfloat16, batch_tile=None,
                             smoothing=False):
    """query: (B,1,D), value: (B,S,D), last_alignment_energy: (B,S) or None.

    Returns (context (B,1,D) f32, alignment (B,S) f32).  MXU operands use `compute_dtype`
    (bf16 default, f32 accumulation); compute_dtype=jnp.float32 is the exact path
    (exact reciprocal, f32 matmuls).  Element-wise math is always f32.
    """
    if smoothing:
        # TODO(synk): smoothing=True (sigmoid + renormalize) branch is not implemented.
        raise NotImplementedError("smoothing=True path is not implemented")

    B, q_len, D = query.shape
    assert q_len == 1, "reference broadcast semantics require q_len == 1"
    S = value.shape[1]
    A = params["wq"].shape[1]

    if last_alignment_energy is None:
        last_alignment_energy = jnp.zeros((B, S), dtype=jnp.float32)

    cdt = jnp.dtype(compute_dtype)
    is_f32 = cdt == jnp.dtype(jnp.float32)

    n_cores = _num_tensorcores()
    vmem_cap = int(_physical_vmem_bytes() * 0.75)        # <= ~48 MiB v7x, ~96 MiB v5e/v6e

    # Pad seq to a sublane multiple so in-kernel leading-dim collapses stay layout-preserving.
    s_pad = _round_up(S, 8)
    d_extra = 8                                           # 3 conv taps + 5 zero-pad features
    d_eff = D + d_extra
    # Pad batch so bt can be a multiple of 8 (and the grid length even on 2-TC chips).
    b_pad = _round_up(B, 16 if n_cores >= 2 else 8) if B > 8 else B

    # ---- wrapper-side data prep: fold the location conv into the value projection -------
    e = last_alignment_energy.astype(jnp.float32)                     # (B, S)
    e_prev = jnp.pad(e, ((0, 0), (1, 0)))[:, :S]                      # e[:, s-1], 0 at s=0
    e_next = jnp.pad(e, ((0, 0), (0, 1)))[:, 1:]                      # e[:, s+1], 0 at s=S-1
    e_feats = jnp.stack([e_prev, e, e_next], axis=-1)                 # (B, S, 3)
    e_feats = jnp.pad(e_feats, ((0, 0), (0, 0), (0, d_extra - 3)))    # (B, S, 8)
    v_aug = jnp.concatenate([value.astype(jnp.float32), e_feats], axis=-1).astype(cdt)
    q2 = query.reshape(B, D).astype(cdt)
    if b_pad != B or s_pad != S:
        v_aug = jnp.pad(v_aug, ((0, b_pad - B), (0, s_pad - S), (0, 0)))
        q2 = jnp.pad(q2, ((0, b_pad - B), (0, 0)))

    wq = params["wq"].astype(cdt)                                     # (D, A)
    wv_aug = jnp.concatenate(
        [params["wv"], params["conv_w"],
         jnp.zeros((d_extra - 3, A), jnp.float32)], axis=0).astype(cdt)          # (D+8, A)
    qadd = (params["bias"].reshape(1, A) + params["conv_b"].reshape(1, A)).astype(jnp.float32)
    fc_row = params["fc_w"].reshape(1, A).astype(cdt)                 # fc weight, lane-dense row
    # params["fc_b"] intentionally unused: softmax is shift-invariant.

    # ---- batch tile + VMEM limit (generation-aware) --------------------------------------
    step_bytes = functools.partial(_step_vmem_bytes, s_pad=s_pad, d=D, d_eff=d_eff,
                                   a=A, cdt=cdt)
    bt = batch_tile if batch_tile is not None else _select_batch_tile(
        b_pad, step_bytes, vmem_cap // 2, n_cores)
    if b_pad % bt != 0 or not (bt == b_pad or bt % 8 == 0):
        raise ValueError(f"batch_tile={bt} must divide padded batch {b_pad} and be a "
                         f"multiple of 8 (or equal it)")
    grid = (b_pad // bt,)
    vmem_limit = int(min(vmem_cap, max(2 * step_bytes(bt), 16 << 20)))

    kernel = functools.partial(_law_attn_kernel, s_true=S, d_true=D,
                               approx_recip=not is_f32)
    const = lambda i: (0, 0)

    context, attn = pl.pallas_call(
        kernel,
        out_shape=(
            jax.ShapeDtypeStruct((b_pad, D), jnp.float32),        # context, sublane-dense
            jax.ShapeDtypeStruct((b_pad, s_pad), jnp.float32),    # alignment, lane-dense rows
        ),
        grid=grid,
        in_specs=[
            pl.BlockSpec((bt, D), lambda i: (i, 0)),              # query
            pl.BlockSpec((bt, s_pad, d_eff), lambda i: (i, 0, 0)),# value ++ shifted energies
            pl.BlockSpec((D, A), const),                          # Wq
            pl.BlockSpec((d_eff, A), const),                      # [Wv ; conv_w ; 0]
            pl.BlockSpec((1, A), const),                          # bias + conv bias row
            pl.BlockSpec((1, A), const),                          # fc weight row
        ],
        out_specs=(
            pl.BlockSpec((bt, D), lambda i: (i, 0)),
            pl.BlockSpec((bt, s_pad), lambda i: (i, 0)),
        ),
        compiler_params=pltpu.CompilerParams(
            dimension_semantics=("parallel",),        # even grid length -> both TCs on v7x
            vmem_limit_bytes=vmem_limit),
    )(q2, v_aug, wq, wv_aug, qadd, fc_row)

    return context[:B, None, :], attn[:B, :S]


# ----------------------------------------------------------------------------------------
# Params + pure-JAX reference
# ----------------------------------------------------------------------------------------
def make_params(key, dim, attn_dim):
    ks = jax.random.split(key, 6)
    u = lambda k, shape: jax.random.uniform(k, shape, jnp.float32, -0.1, 0.1)
    return {
        "wq": u(ks[0], (dim, attn_dim)),              # query_proj weight (D, A)
        "wv": u(ks[1], (dim, attn_dim)),              # value_proj weight (D, A)
        "conv_w": u(ks[2], (3, attn_dim)),            # Conv1d weight, taps-major (3, A)
        "conv_b": u(ks[3], (1, attn_dim)),            # Conv1d bias
        "bias": u(ks[4], (1, attn_dim)),              # module's bias Parameter
        "fc_w": u(ks[5], (attn_dim, 1)),              # fc weight
        "fc_b": jnp.full((1, 1), 0.01, jnp.float32),  # fc bias (no effect post-softmax)
    }


def reference(query, value, energy, params):
    """Pure-JAX f32 reference mirroring the PyTorch forward (fc bias included)."""
    qp = query @ params["wq"]                          # (B,1,A)
    vp = value @ params["wv"]                          # (B,S,A)
    e_pad = jnp.pad(energy, ((0, 0), (1, 1)))
    cw = params["conv_w"]
    conv = (e_pad[:, :-2, None] * cw[0][None, None, :]
            + energy[:, :, None] * cw[1][None, None, :]
            + e_pad[:, 2:, None] * cw[2][None, None, :]
            + params["conv_b"][None, :, :])            # (B,S,A)
    pre = jnp.tanh(qp + vp + conv + params["bias"][None, :, :])
    en = (pre @ params["fc_w"])[..., 0] + params["fc_b"][0, 0]       # (B,S)
    attn = jax.nn.softmax(en, axis=-1)
    ctx = jnp.einsum("bs,bsd->bd", attn, value)[:, None, :]          # (B,1,D)
    return ctx, attn


if __name__ == "__main__":
    B, S, DIM, ATTN_DIM = 16, 20, 32, 48   # S not a multiple of 8 -> exercises padding path
    key = jax.random.PRNGKey(0)
    kq, kv, ke, kp = jax.random.split(key, 4)

    query = jax.random.normal(kq, (B, 1, DIM), jnp.float32)
    value = jax.random.normal(kv, (B, S, DIM), jnp.float32)
    last_energy = jax.random.uniform(ke, (B, S), jnp.float32)
    params = make_params(kp, DIM, ATTN_DIM)

    ctx_ref, attn_ref = reference(query, value, last_energy, params)

    # exact-precision path (f32 MXU operands, exact reciprocal)
    run_f32 = jax.jit(functools.partial(location_aware_attention,
                                        compute_dtype=jnp.float32))
    ctx32, attn32 = run_f32(query, value, last_energy, params)
    jax.block_until_ready((ctx32, attn32))
    assert ctx32.shape == (B, 1, DIM) and attn32.shape == (B, S)
    assert jnp.allclose(ctx32, ctx_ref, atol=5e-3, rtol=5e-3), "context mismatch (f32)"
    assert jnp.allclose(attn32, attn_ref, atol=5e-3, rtol=5e-3), "alignment mismatch (f32)"

    # default perf path (bf16 MXU operands, f32 accumulation / element-wise)
    run_bf16 = jax.jit(location_aware_attention)
    ctx16, attn16 = run_bf16(query, value, last_energy, params)
    jax.block_until_ready((ctx16, attn16))
    assert jnp.allclose(ctx16, ctx_ref, atol=3e-2, rtol=3e-2), "context mismatch (bf16)"
    assert jnp.allclose(attn16, attn_ref, atol=3e-2, rtol=3e-2), "alignment mismatch (bf16)"

    print("KERNEL_OK")
</pallas_src>

<mosaic_0001>
module attributes {stable_mosaic.version = 11 : i64} {
  func.func @_law_attn_kernel(%arg0: i32, %arg1: memref<16x32xf32, #tpu.memory_space<vmem>>, %arg2: memref<16x24x40xf32, #tpu.memory_space<vmem>>, %arg3: memref<32x48xf32, #tpu.memory_space<vmem>>, %arg4: memref<40x48xf32, #tpu.memory_space<vmem>>, %arg5: memref<1x48xf32, #tpu.memory_space<vmem>>, %arg6: memref<1x48xf32, #tpu.memory_space<vmem>>, %arg7: memref<16x32xf32, #tpu.memory_space<vmem>>, %arg8: memref<16x24xf32, #tpu.memory_space<vmem>>) attributes {dimension_semantics = [#tpu.dimension_semantics<parallel>], iteration_bounds = array<i64: 1>, scalar_prefetch = 0 : i64, scratch_operands = 0 : i64, tpu.core_type = #tpu.core_type<tc>, window_params = [{transform_indices = @transform_0, window_bounds = array<i64: 16, 32>}, {transform_indices = @transform_1, window_bounds = array<i64: 16, 24, 40>}, {pipeline_mode = #tpu.pipeline_mode<synchronous>, transform_indices = @transform_2, window_bounds = array<i64: 32, 48>}, {pipeline_mode = #tpu.pipeline_mode<synchronous>, transform_indices = @transform_3, window_bounds = array<i64: 40, 48>}, {pipeline_mode = #tpu.pipeline_mode<synchronous>, transform_indices = @transform_4, window_bounds = array<i64: 1, 48>}, {pipeline_mode = #tpu.pipeline_mode<synchronous>, transform_indices = @transform_5, window_bounds = array<i64: 1, 48>}, {transform_indices = @transform_6, window_bounds = array<i64: 16, 32>}, {transform_indices = @transform_7, window_bounds = array<i64: 16, 24>}]} {
    %c0 = arith.constant 0 : index
    %c0_0 = arith.constant 0 : index
    %c0_1 = arith.constant 0 : index
    %0 = vector.load %arg2[%c0, %c0_0, %c0_1] : memref<16x24x40xf32, #tpu.memory_space<vmem>>, vector<16x24x40xf32>
    %1 = vector.shape_cast %0 : vector<16x24x40xf32> to vector<384x40xf32>
    %c0_2 = arith.constant 0 : index
    %c0_3 = arith.constant 0 : index
    %2 = vector.load %arg4[%c0_2, %c0_3] : memref<40x48xf32, #tpu.memory_space<vmem>>, vector<40x48xf32>
    %cst = arith.constant dense<0.000000e+00> : vector<384x48xf32>
    %3 = tpu.matmul %1, %2, %cst {dimension_numbers = #tpu.dot_dimension_numbers<[1], [0], [0], [1], [0, 0, 1, 1], [], []>} : vector<384x40xf32>, vector<40x48xf32>, vector<384x48xf32> -> vector<384x48xf32>
    %c0_4 = arith.constant 0 : index
    %c0_5 = arith.constant 0 : index
    %4 = vector.load %arg1[%c0_4, %c0_5] : memref<16x32xf32, #tpu.memory_space<vmem>>, vector<16x32xf32>
    %c0_6 = arith.constant 0 : index
    %c0_7 = arith.constant 0 : index
    %5 = vector.load %arg3[%c0_6, %c0_7] : memref<32x48xf32, #tpu.memory_space<vmem>>, vector<32x48xf32>
    %cst_8 = arith.constant dense<0.000000e+00> : vector<16x48xf32>
    %6 = tpu.matmul %4, %5, %cst_8 {dimension_numbers = #tpu.dot_dimension_numbers<[1], [0], [0], [1], [0, 0, 1, 1], [], []>} : vector<16x32xf32>, vector<32x48xf32>, vector<16x48xf32> -> vector<16x48xf32>
    %c0_9 = arith.constant 0 : index
    %c0_10 = arith.constant 0 : index
    %7 = vector.load %arg5[%c0_9, %c0_10] : memref<1x48xf32, #tpu.memory_space<vmem>>, vector<1x48xf32>
    %8 = vector.broadcast %7 : vector<1x48xf32> to vector<16x48xf32>
    %9 = arith.addf %6, %8 : vector<16x48xf32>
    %10 = vector.shape_cast %3 : vector<384x48xf32> to vector<16x24x48xf32>
    %11 = vector.shape_cast %9 : vector<16x48xf32> to vector<16x1x48xf32>
    %12 = vector.broadcast %11 : vector<16x1x48xf32> to vector<16x24x48xf32>
    %13 = arith.addf %10, %12 : vector<16x24x48xf32>
    %14 = math.tanh %13 : vector<16x24x48xf32>
    %c0_11 = arith.constant 0 : index
    %c0_12 = arith.constant 0 : index
    %15 = vector.load %arg6[%c0_11, %c0_12] : memref<1x48xf32, #tpu.memory_space<vmem>>, vector<1x48xf32>
    %16 = vector.shape_cast %15 : vector<1x48xf32> to vector<1x1x48xf32>
    %17 = vector.shape_cast %16 : vector<1x1x48xf32> to vector<1x1x48xf32>
    %18 = vector.broadcast %17 : vector<1x1x48xf32> to vector<16x1x48xf32>
    "tpu.trace_start"() <{level = 10 : i32, message = "bka,bsa->bks"}> : () -> ()
    %cst_13 = arith.constant dense<0.000000e+00> : vector<16x1x24xf32>
    %19 = tpu.matmul %18, %14, %cst_13 {dimension_numbers = #tpu.dot_dimension_numbers<[2], [2], [1], [1], [0, 0, 0, 1, 1, 1], [0], [0]>} : vector<16x1x48xf32>, vector<16x24x48xf32>, vector<16x1x24xf32> -> vector<16x1x24xf32>
    "tpu.trace_stop"() : () -> ()
    %20 = tpu.iota {dimensions = array<i32: 2>} : vector<16x1x24xi32>
    %c20_i32 = arith.constant 20 : i32
    %21 = vector.broadcast %c20_i32 : i32 to vector<16x1x24xi32>
    %22 = arith.cmpi slt, %20, %21 : vector<16x1x24xi32>
    %cst_14 = arith.constant -1.000000e+30 : f32
    %23 = vector.broadcast %cst_14 : f32 to vector<16x1x24xf32>
    %24 = arith.select %22, %19, %23 : vector<16x1x24xi1>, vector<16x1x24xf32>
    %cst_15 = arith.constant dense<0xFF800000> : vector<16x1xf32>
    %25 = vector.multi_reduction <maximumf>, %24, %cst_15 [2] : vector<16x1x24xf32> to vector<16x1xf32>
    %26 = vector.shape_cast %25 : vector<16x1xf32> to vector<16x1x1xf32>
    %27 = vector.broadcast %26 : vector<16x1x1xf32> to vector<16x1x24xf32>
    %28 = arith.subf %24, %27 : vector<16x1x24xf32>
    %29 = math.exp %28 : vector<16x1x24xf32>
    %cst_16 = arith.constant dense<0.000000e+00> : vector<16x1xf32>
    %30 = vector.multi_reduction <add>, %29, %cst_16 [2] : vector<16x1x24xf32> to vector<16x1xf32>
    %31 = vector.shape_cast %30 : vector<16x1xf32> to vector<16x1x1xf32>
    %32 = tpu.reciprocal %31 : vector<16x1x1xf32> -> vector<16x1x1xf32>
    %33 = vector.broadcast %32 : vector<16x1x1xf32> to vector<16x1x24xf32>
    %34 = arith.mulf %29, %33 : vector<16x1x24xf32>
    %35 = vector.extract_strided_slice %0 {offsets = [0, 0, 0], sizes = [16, 24, 32], strides = [1, 1, 1]} : vector<16x24x40xf32> to vector<16x24x32xf32>
    "tpu.trace_start"() <{level = 10 : i32, message = "bqs,bsd->bqd"}> : () -> ()
    %cst_17 = arith.constant dense<0.000000e+00> : vector<16x1x32xf32>
    %36 = tpu.matmul %34, %35, %cst_17 {dimension_numbers = #tpu.dot_dimension_numbers<[2], [1], [1], [2], [0, 0, 0, 1, 1, 2], [0], [0]>} : vector<16x1x24xf32>, vector<16x24x32xf32>, vector<16x1x32xf32> -> vector<16x1x32xf32>
    "tpu.trace_stop"() : () -> ()
    %37 = vector.shape_cast %34 : vector<16x1x24xf32> to vector<16x24xf32>
    %c0_18 = arith.constant 0 : index
    %c0_19 = arith.constant 0 : index
    %38 = vector.load %arg8[%c0_18, %c0_19] : memref<16x24xf32, #tpu.memory_space<vmem>>, vector<16x24xf32>
    tpu.vector_store %arg8[%c0_18, %c0_19], %37 {strides = array<i32>} : memref<16x24xf32, #tpu.memory_space<vmem>>, vector<16x24xf32>,
    %39 = vector.shape_cast %36 : vector<16x1x32xf32> to vector<16x32xf32>
    %c0_20 = arith.constant 0 : index
    %c0_21 = arith.constant 0 : index
    %40 = vector.load %arg7[%c0_20, %c0_21] : memref<16x32xf32, #tpu.memory_space<vmem>>, vector<16x32xf32>
    tpu.vector_store %arg7[%c0_20, %c0_21], %39 {strides = array<i32>} : memref<16x32xf32, #tpu.memory_space<vmem>>, vector<16x32xf32>,
    return
  }
  func.func @transform_0(%arg0: i32) -> (i32, i32) {
    %c0_i32 = arith.constant 0 : i32
    %c0_i32_0 = arith.constant 0 : i32
    return %arg0, %c0_i32 : i32, i32
  }
  func.func @transform_1(%arg0: i32) -> (i32, i32, i32) {
    %c0_i32 = arith.constant 0 : i32
    %c0_i32_0 = arith.constant 0 : i32
    %c0_i32_1 = arith.constant 0 : i32
    return %arg0, %c0_i32, %c0_i32_0 : i32, i32, i32
  }
  func.func @transform_2(%arg0: i32) -> (i32, i32) {
    %c0_i32 = arith.constant 0 : i32
    %c0_i32_0 = arith.constant 0 : i32
    %c0_i32_1 = arith.constant 0 : i32
    return %c0_i32, %c0_i32_0 : i32, i32
  }
  func.func @transform_3(%arg0: i32) -> (i32, i32) {
    %c0_i32 = arith.constant 0 : i32
    %c0_i32_0 = arith.constant 0 : i32
    %c0_i32_1 = arith.constant 0 : i32
    return %c0_i32, %c0_i32_0 : i32, i32
  }
  func.func @transform_4(%arg0: i32) -> (i32, i32) {
    %c0_i32 = arith.constant 0 : i32
    %c0_i32_0 = arith.constant 0 : i32
    %c0_i32_1 = arith.constant 0 : i32
    return %c0_i32, %c0_i32_0 : i32, i32
  }
  func.func @transform_5(%arg0: i32) -> (i32, i32) {
    %c0_i32 = arith.constant 0 : i32
    %c0_i32_0 = arith.constant 0 : i32
    %c0_i32_1 = arith.constant 0 : i32
    return %c0_i32, %c0_i32_0 : i32, i32
  }
  func.func @transform_6(%arg0: i32) -> (i32, i32) {
    %c0_i32 = arith.constant 0 : i32
    %c0_i32_0 = arith.constant 0 : i32
    return %arg0, %c0_i32 : i32, i32
  }
  func.func @transform_7(%arg0: i32) -> (i32, i32) {
    %c0_i32 = arith.constant 0 : i32
    %c0_i32_0 = arith.constant 0 : i32
    return %arg0, %c0_i32 : i32, i32
  }
}

</mosaic_0001>

<bundles_post_ra>
// kernel: location_aware_attention.1
= control target key start
LH: loop header
LB: loop body
LE: loop exit
PB: predicated region body
PF: predicated region fallthrough
CT: control target
= control target key end

     0   :  { %13 = vsyncpa [#allocation3], 0  ;;  %vm543_vm0 = vcmask 261120   ;;  %vm80_vm1 = vcmask 326656   ;;  %s5907_s0 = inlined_call_operand.vmem [shape: f32[16,32], index: 0, kind: input, shape index: {}]   ;;  %s5908_s1 = inlined_call_operand.vmem [shape: f32[16,24,40], index: 1, kind: input, shape index: {}]   ;;  %s5909_s2 = inlined_call_operand.vmem [shape: f32[32,48], index: 2, kind: input, shape index: {}]   ;;  %s5910_s3 = inlined_call_operand.vmem [shape: f32[40,48], index: 3, kind: input, shape index: {}]   ;;  %s5911_s4 = inlined_call_operand.vmem [shape: f32[1,48], index: 4, kind: input, shape index: {}]   ;;  %s5912_s5 = inlined_call_operand.vmem [shape: f32[1,48], index: 5, kind: input, shape index: {}]   ;;  %s5913_s6 = inlined_call_operand.hbm [shape: f32[16,32], index: 6, kind: output, shape index: {0}]   ;;  %s5914_s7 = inlined_call_operand.hbm [shape: f32[16,24], index: 7, kind: output, shape index: {1}]  }
   0x1   :  { %v75_v0 = vld [vmem:[%s5910_s3] sm:$0xff]  ;;  %v76_v1 = vld [vmem:[%s5910_s3 + $0x8] sm:$0xff]  ;;  %v77_v5 = vld [vmem:[%s5910_s3 + $0x10] sm:$0xff] }
   0x2   :  { %v532_v2 = vld [vmem:[%s5909_s2] sm:$0xff]  ;;  %v4353_v3 = vpack.c.bf16 %v76_v1, %v75_v0  ;;  %v533_v4 = vld [vmem:[%s5909_s2 + $0x8] sm:$0xff]  ;;  %v78_v6 = vld [vmem:[%s5910_s3 + $0x18] sm:$0xff] }
   0x3   :  { %v4361_v7 = vpack.c.bf16 %v533_v4, %v532_v2  ;;  %v4357_v8 = vpack.c.bf16 %v78_v6, %v77_v5  ;;  %v534_v9 = vld [vmem:[%s5909_s2 + $0x10] sm:$0xff]  ;;  %v535_v10 = vld [vmem:[%s5909_s2 + $0x18] sm:$0xff]  ;;  %v530_v11 = vld [vmem:[%s5907_s0] sm:$0xff] }
   0x4   :  { %4354 = vmatprep.subr.bf16.mxu0 %v4353_v3  ;;  %v4365_v12 = vpack.c.bf16 %v535_v10, %v534_v9  ;;  %4062 = vmatprep.mubr.msk.f32.mxu1 %vm543_vm0, %v530_v11  ;;  %v4798_v13 = vld [vmem:[%s5908_s1] sm:$0xff]  ;;  %v4803_v14 = vld [vmem:[%s5908_s1 + $0x8] sm:$0xff]  ;;  %v4810_v16 = vld [vmem:[%s5908_s1 + $0x18] sm:$0xff] }
   0x5   :  { %4362 = vmatprep.subr.bf16.mxu1 %v4361_v7  ;;  %4356 = vmatpush3.bf16.msra.mxu0 %v4353_v3  ;;  %v4815_v17 = vld [vmem:[%s5908_s1 + $0x20] sm:$0xff]  ;;  %v4827_v20 = vld [vmem:[%s5908_s1 + $0x30] sm:$0xff]  ;;  %v4832_v21 = vld [vmem:[%s5908_s1 + $0x38] sm:$0xff] }
   0x6   :  { %4364 = vmatpush3.bf16.msra.mxu1 %v4361_v7  ;;  %4358 = vmatprep.subr.bf16.mxu0 %v4357_v8  ;;  %v79_v18 = vld [vmem:[%s5910_s3 + $0x20] sm:$0xff]  ;;  %v4839_v23 = vld [vmem:[%s5908_s1 + $0x48] sm:$0xff]  ;;  %v4844_v24 = vld [vmem:[%s5908_s1 + $0x50] sm:$0xff] }
   0x7   :  { %4366 = vmatprep.subr.bf16.mxu1 %v4365_v12  ;;  %3982 = vmatprep.mubr.msk.f32.mxu0 %vm80_vm1, %v4798_v13  ;;  %v4851_v26 = vld [vmem:[%s5908_s1 + $0x60] sm:$0xff]  ;;  %v4856_v27 = vld [vmem:[%s5908_s1 + $0x68] sm:$0xff]  ;;  %v4866_v30 = vld [vmem:[%s5908_s1 + $0x78] sm:$0xff] }
   0x8   :  { %v531_v28 = vld [vmem:[%s5907_s0 + $0x8] sm:$0xff]  ;;  %v4871_v31 = vld [vmem:[%s5908_s1 + $0x80] sm:$0xff]  ;;  %v4878_v33 = vld [vmem:[%s5908_s1 + $0x90] sm:$0xff] }
   0x9   :  { %4360 = vmatpush3.bf16.msra.mxu0 %v4357_v8  ;;  %v4883_v34 = vld [vmem:[%s5908_s1 + $0x98] sm:$0xff]  ;;  %v4888_v35 = vld [vmem:[%s5908_s1 + $0x10] sm:$0xff]  ;;  %v4895_v37 = vld [vmem:[%s5908_s1 + $0xa8] sm:$0xff] }
   0xa   :  { %4368 = vmatpush3.bf16.msra.mxu1 %v4365_v12  ;;  %3980 = vmatprep.subr.mxu0 %v79_v18  ;;  %v4900_v38 = vld [vmem:[%s5908_s1 + $0xb0] sm:$0xff]  ;;  %v4908_v40 = vld [vmem:[%s5908_s1 + $0xc0] sm:$0xff]  ;;  %v4913_v41 = vld [vmem:[%s5908_s1 + $0xc8] sm:$0xff] }
   0xb   :  { %v4922_v43 = vld [vmem:[%s5908_s1 + $0xd8] sm:$0xff]  ;;  %v4927_v44 = vld [vmem:[%s5908_s1 + $0xe0] sm:$0xff]  ;;  %v4936_v46 = vld [vmem:[%s5908_s1 + $0xf0] sm:$0xff] }
   0xc   :  { %v4941_v47 = vld [vmem:[%s5908_s1 + $0xf8] sm:$0xff]  ;;  %v4948_v49 = vld [vmem:[%s5908_s1 + $0x108] sm:$0xff]  ;;  %v4953_v50 = vld [vmem:[%s5908_s1 + $0x110] sm:$0xff] }
   0xd   :  { %4063 = vmatmul.mubr.msk.f32.vlgmr.msra.gmra.mrb[0].mxu1 %vm543_vm0, %v531_v28  ;;  %3981 = vmatpush3.msra.mxu0 %v79_v18  ;;  %v32_v52 = vld [vmem:[%s5908_s1 + $0x28] sm:$0xff] }
   0xe   :  { %3983 = vmatmul.mubr.msk.f32.vlgmr.msra.gmra.mrb[0].mxu0 %vm80_vm1, %v4803_v14 }
   0xf   :  { %3985 = vmatprep.mubr.msk.f32.mxu0 %vm80_vm1, %v4888_v35 }
  0x12   :  { %3986 = vmatmul.mubr.msk.f32.gmra.mrb[2].mxu0 %vm80_vm1, %v4810_v16 }
  0x13   :  { %3988 = vmatprep.mubr.msk.f32.mxu0 %vm80_vm1, %v4815_v17 }
  0x14   :  { %14 = vsyncpa [#allocation5], 0  ;;  %v4970_v53 = vld [vmem:[%s5908_s1 + $0x40] sm:$0xff]  ;;  %v38_v54 = vld [vmem:[%s5908_s1 + $0x58] sm:$0xff]  ;;  %v5916_v11 = vmov 0.0|0.0   ;;  %vm4720_vm2 = vmmov 0  }
  0x15   :  { %v41_v55 = vld [vmem:[%s5908_s1 + $0x70] sm:$0xff]  ;;  %v44_v56 = vld [vmem:[%s5908_s1 + $0x88] sm:$0xff]  ;;  %v47_v57 = vld [vmem:[%s5908_s1 + $0xa0] sm:$0xff]  ;;  %4369 = vmatprep.subr.bf16.mxu1 %v5916_v11  ;;  %4401 = vmatprep.subr.bf16.mxu0 %v5916_v11  ;;  %v5918_v12 = vmov 0.0   ;;  %v4722_v18 = vmov 1966171168  }
  0x16   :  { %3989 = vmatmul.mubr.msk.f32.gmra.mrb[4].mxu0 %vm80_vm1, %v32_v52  ;;  %v50_v58 = vld [vmem:[%s5908_s1 + $0xb8] sm:$0xff]  ;;  %v53_v59 = vld [vmem:[%s5908_s1 + $0xd0] sm:$0xff]  ;;  %v56_v60 = vld [vmem:[%s5908_s1 + $0xe8] sm:$0xff]  ;;  %4071 = vmatprep.mubr.msk.f32.mxu1 %vm4720_vm2, %v5918_v12  ;;  %v629_v28 = vunpack.c.l.s4 %v4722_v18  ;;  %v5915_v52 = vlaneseq  ;;  %vm902_vm3 = vcmask 392192   ;;  %vm2189_vm6 = vcmask 188416  }
  0x17   :  { %3991 = vmatprep.mubr.msk.f32.mxu0 %vm80_vm1, %v4827_v20  ;;  %v59_v61 = vld [vmem:[%s5908_s1 + $0x100] sm:$0xff]  ;;  %v62_v62 = vld [vmem:[%s5908_s1 + $0x118] sm:$0xff]  ;;  %v64_v0 = vld [vmem:[%s5908_s1 + $0x128] sm:$0xff]  ;;  %vm2366_vm7 = vcmask 195584   ;;  %vm3536_vm8 = vcmask 1041409   ;;  %vm3539_vm9 = vcmask 1042434  }
  0x18   :  { %v63_v63 = vld [vmem:[%s5908_s1 + $0x120] sm:$0xff]  ;;  %v65_v1 = vld [vmem:[%s5908_s1 + $0x130] sm:$0xff]  ;;  %v66_v2 = vld [vmem:[%s5908_s1 + $0x138] sm:$0xff]  ;;  %vm3542_vm10 = vcmask 1043459   ;;  %vm3545_vm11 = vcmask 1044484   ;;  %vm3548_vm12 = vcmask 1045509  }
  0x19   :  { %v67_v3 = vld [vmem:[%s5908_s1 + $0x140] sm:$0xff]  ;;  %v68_v4 = vld [vmem:[%s5908_s1 + $0x148] sm:$0xff]  ;;  %v69_v5 = vld [vmem:[%s5908_s1 + $0x150] sm:$0xff]  ;;  %vm3551_vm13 = vcmask 1046534   ;;  %vm3554_vm14 = vcmask 1047559  }
  0x1a   :  { %3992 = vmatmul.mubr.msk.f32.gmra.mrb[6].mxu0 %vm80_vm1, %v4832_v21  ;;  %v70_v6 = vld [vmem:[%s5908_s1 + $0x158] sm:$0xff]  ;;  %v71_v7 = vld [vmem:[%s5908_s1 + $0x160] sm:$0xff]  ;;  %v72_v8 = vld [vmem:[%s5908_s1 + $0x168] sm:$0xff] }
  0x1b   :  { %3994 = vmatprep.mubr.msk.f32.mxu0 %vm80_vm1, %v4970_v53  ;;  %v73_v9 = vld [vmem:[%s5908_s1 + $0x170] sm:$0xff]  ;;  %v74_v10 = vld [vmem:[%s5908_s1 + $0x178] sm:$0xff]  ;;  %vm5161_vm4 = vmpackc.low %vm902_vm3, %vm902_vm3 }
  0x1e   :  { %3995 = vmatmul.mubr.msk.f32.gmra.mrb[8].mxu0 %vm80_vm1, %v4839_v23 }
  0x1f   :  { %3997 = vmatprep.mubr.msk.f32.mxu0 %vm80_vm1, %v4844_v24 }
  0x22   :  { %3998 = vmatmul.mubr.msk.f32.gmra.mrb[10].mxu0 %vm80_vm1, %v38_v54  ;;  %v630_v54 = vunpack.c.0.s8 %v629_v28 }
  0x23   :  { %4000 = vmatprep.mubr.msk.f32.mxu0 %vm80_vm1, %v4851_v26 }
  0x26   :  { %4001 = vmatmul.mubr.msk.f32.gmra.mrb[12].mxu0 %vm80_vm1, %v4856_v27 }
  0x27   :  { %4003 = vmatprep.mubr.msk.f32.mxu0 %vm80_vm1, %v41_v55  ;;  %v632_v55 = vshrl.u32 %v5915_v52, 7 }
  0x2a   :  { %4004 = vmatmul.mubr.msk.f32.gmra.mrb[14].mxu0 %vm80_vm1, %v4866_v30 }
  0x2b   :  { %4006 = vmatprep.mubr.msk.f32.mxu0 %vm80_vm1, %v4871_v31 }
  0x2e   :  { %4007 = vmatmul.mubr.msk.f32.gmra.mrb[16].mxu0 %vm80_vm1, %v44_v56  ;;  %v3702_v56 = vld [vmem:[%s5911_s4] ss:$0 sm:$0xff] }
  0x2f   :  { %4009 = vmatprep.mubr.msk.f32.mxu0 %vm80_vm1, %v4878_v33 }
  0x32   :  { %4010 = vmatmul.mubr.msk.f32.gmra.mrb[18].mxu0 %vm80_vm1, %v4883_v34 }
  0x33   :  { %4012 = vmatprep.mubr.msk.f32.mxu0 %vm80_vm1, %v47_v57  ;;  %v5106_v57 = vsub.s32 %v630_v54, %v632_v55 }
  0x36   :  { %4013 = vmatmul.mubr.msk.f32.gmra.mrb[20].mxu0 %vm80_vm1, %v4895_v37 }
  0x37   :  { %4015 = vmatprep.mubr.msk.f32.mxu0 %vm80_vm1, %v4900_v38 }
  0x3a   :  { %4016 = vmatmul.mubr.msk.f32.gmra.mrb[22].mxu0 %vm80_vm1, %v50_v58 }
  0x3b   :  { %4018 = vmatprep.mubr.msk.f32.mxu0 %vm80_vm1, %v4908_v40 }
  0x3e   :  { %4019 = vmatmul.mubr.msk.f32.gmra.mrb[24].mxu0 %vm80_vm1, %v4913_v41 }
  0x3f   :  { %4021 = vmatprep.mubr.msk.f32.mxu0 %vm80_vm1, %v53_v59 }
  0x42   :  { %4022 = vmatmul.mubr.msk.f32.gmra.mrb[26].mxu0 %vm80_vm1, %v4922_v43 }
  0x43   :  { %4024 = vmatprep.mubr.msk.f32.mxu0 %vm80_vm1, %v4927_v44 }
  0x46   :  { %4025 = vmatmul.mubr.msk.f32.gmra.mrb[28].mxu0 %vm80_vm1, %v56_v60 }
  0x47   :  { %4027 = vmatprep.mubr.msk.f32.mxu0 %vm80_vm1, %v4936_v46 }
  0x4a   :  { %4028 = vmatmul.mubr.msk.f32.gmra.mrb[30].mxu0 %vm80_vm1, %v4941_v47 }
  0x4b   :  { %4030 = vmatprep.mubr.msk.f32.mxu0 %vm80_vm1, %v59_v61 }
  0x4e   :  { %4031 = vmatmul.mubr.msk.f32.gmra.mrb[32].mxu0 %vm80_vm1, %v4948_v49 }
  0x4f   :  { %4033 = vmatprep.mubr.msk.f32.mxu0 %vm80_vm1, %v4953_v50 }
  0x52   :  { %4034 = vmatmul.mubr.msk.f32.gmra.mrb[34].mxu0 %vm80_vm1, %v62_v62 }
  0x53   :  { %4036 = vmatprep.mubr.msk.f32.mxu0 %vm80_vm1, %v63_v63 }
  0x56   :  { %4037 = vmatmul.mubr.msk.f32.gmra.mrb[36].mxu0 %vm80_vm1, %v64_v0 }
  0x57   :  { %4039 = vmatprep.mubr.msk.f32.mxu0 %vm80_vm1, %v65_v1 }
  0x5a   :  { %4040 = vmatmul.mubr.msk.f32.gmra.mrb[38].mxu0 %vm80_vm1, %v66_v2 }
  0x5b   :  { %4042 = vmatprep.mubr.msk.f32.mxu0 %vm80_vm1, %v67_v3 }
  0x5e   :  { %4043 = vmatmul.mubr.msk.f32.gmra.mrb[40].mxu0 %vm80_vm1, %v68_v4 }
  0x5f   :  { %4045 = vmatprep.mubr.msk.f32.mxu0 %vm80_vm1, %v69_v5 }
  0x62   :  { %4046 = vmatmul.mubr.msk.f32.gmra.mrb[42].mxu0 %vm80_vm1, %v70_v6  ;;  %v5115_v6 = vsub.s32 0, %v632_v55 }
  0x63   :  { %4048 = vmatprep.mubr.msk.f32.mxu0 %vm80_vm1, %v71_v7 }
  0x66   :  { %4049 = vmatmul.mubr.msk.f32.gmra.mrb[44].mxu0 %vm80_vm1, %v72_v8 }
  0x67   :  { %4051 = vmatprep.mubr.msk.f32.mxu0 %vm80_vm1, %v73_v9 }
  0x6a   :  { %4052 = vmatmul.mubr.msk.f32.gmra.mrb[46].mxu0 %vm80_vm1, %v74_v10 }
  0x6b   :  { %4143 = vmatprep.mubr.msk.f32.mxu0 %vm4720_vm2, %v5918_v12 }
  0xe0   :  { %v4064_v58 = vpop.f32.mrb[0].mxu1 }
  0xe1   :  { %v622_v59 = vadd.f32 %v4064_v58, %v3702_v56  ;;  %v616_v60 = vpop.f32.mrb[1].mxu1  ;;  %v3984_v61 = vpop.f32.mrb[0].mxu0 }
  0xe2   :  { %v617_v62 = vadd.f32 %v3702_v56, %v616_v60  ;;  %v291_v63 = vpop.f32.mrb[1].mxu0 }
  0xe3   :  { %v676_v0 = vcombine.high %v622_v59, %v622_v59  ;;  %v5109_v1 = vrot.slane %v622_v59, %v5106_v57 }
  0xe4   :  { %v627_v2 = vcombine.high %v617_v62, %v617_v62  ;;  %v634_v3 = vrot.slane %v617_v62, %v5106_v57 }
  0xe5   :  { %v690_v4 = vrot.slane %v676_v0, %v5106_v57  ;;  %v691_v5 = vcombine.high %v5109_v1, %v5109_v1  ;;  %v3987_v7 = vpop.f32.mrb[2].mxu0 }
  0xe6   :  { %v641_v8 = vrot.slane %v627_v2, %v5106_v57  ;;  %v642_v9 = vcombine.high %v634_v3, %v634_v3  ;;  %v650_v10 = vrot.slane %v634_v3, %v5106_v57  ;;  %v301_v18 = vpop.f32.mrb[3].mxu0 }
  0xe7   :  { %v706_v28 = vrot.slane %v690_v4, %v5106_v57  ;;  %v713_v54 = vrot.slane %v691_v5, %v5106_v57  ;;  %v692_v2 = vcombine.high %v690_v4, %v690_v4 }
  0xe8   :  { %v643_v56 = vcombine.high %v641_v8, %v641_v8  ;;  %v664_v58 = vrot.slane %v642_v9, %v5106_v57  ;;  %v672_v59 = vcombine.high %v650_v10, %v650_v10  ;;  %v657_v60 = vrot.slane %v641_v8, %v5106_v57 }
  0xe9   :  { %v728_v55 = vrot.slane %v650_v10, %v5115_v6  ;;  %v3990_v62 = vpop.f32.mrb[4].mxu0  ;;  %v5125_v0 = vrot.slane %v713_v54, %v5115_v6  ;;  %v723_v52 = vcombine.high %v713_v54, %v713_v54 }
  0xea   :  { %v732_v3 = vrot.slane %v664_v58, %v5115_v6  ;;  %v311_v51 = vpop.f32.mrb[5].mxu0  ;;  %v674_v45 = vcombine.high %v664_v58, %v664_v58  ;;  %v671_v39 = vrot.slane %v643_v56, %v5106_v57  ;;  %v736_v10 = vrot.slane %v672_v59, %v5115_v6 }
  0xeb   :  { %v806_v48 = vadd.f32 %v3984_v61, %v728_v55  ;;  %v805_v42 = vadd.f32 %v728_v55, %v291_v63  ;;  %v807_v5 = vadd.f32 %v728_v55, %v301_v18  ;;  %v673_v29 = vcombine.high %v657_v60, %v657_v60 }
  0xec   :  { %v808_v9 = vadd.f32 %v3987_v7, %v732_v3  ;;  %v5129_v36 = vadd.f32 %v3990_v62, %v732_v3  ;;  %v809_v8 = vadd.f32 %v732_v3, %v311_v51  ;;  %v675_v25 = vcombine.high %v671_v39, %v671_v39 }
  0xed   :  { %4489 = vtanh.f32 %v806_v48  ;;  %v3993_v32 = vpop.f32.mrb[6].mxu0  ;;  %v5133_v61 = vrot.slane %v706_v28, %v5115_v6  ;;  %v740_v18 = vrot.slane %v674_v45, %v5115_v6  ;;  %v5137_v7 = vrot.slane %v673_v29, %v5115_v6 }
  0xee   :  { %4491 = vtanh.f32 %v805_v42  ;;  %v812_v4 = vadd.f32 %v3993_v32, %v736_v10  ;;  %v321_v19 = vpop.f32.mrb[7].mxu0  ;;  %v5140_v51 = vrot.slane %v675_v25, %v5115_v6  ;;  %v5143_v48 = vrot.slane %v723_v52, %v5115_v6 }
  0xef   :  { %v811_v63 = vadd.f32 %v736_v10, %v321_v19  ;;  %4493 = vtanh.f32 %v808_v9  ;;  %v720_v32 = vrot.slane %v692_v2, %v5106_v57  ;;  %v722_v42 = vcombine.high %v706_v28, %v706_v28 }
  0xf0   :  { %4495 = vtanh.f32 %v809_v8  ;;  %v744_v8 = vrot.slane %v657_v60, %v5115_v6  ;;  %v5930_v9 = vlaneseq }
  0xf1   :  { %v3996_v54 = vpop.f32.mrb[8].mxu0  ;;  %v5147_v19 = vrot.slane %v720_v32, %v5115_v6  ;;  %v5150_v29 = vrot.slane %v722_v42, %v5115_v6  ;;  %4497 = vtanh.f32 %v812_v4  ;;  %v724_v45 = vcombine.high %v720_v32, %v720_v32 }
  0xf2   :  { %v814_v56 = vadd.f32 %v3996_v54, %v740_v18  ;;  %v331_v58 = vpop.f32.mrb[9].mxu0  ;;  %4499 = vtanh.f32 %v811_v63  ;;  %v748_v54 = vrot.slane %v671_v39, %v5115_v6 }
  0xf3   :  { %v5152_v25 = vadd.f32 %v736_v10, %v331_v58  ;;  %v5155_v59 = vrot.slane %v724_v45, %v5115_v6  ;;  %4501 = vtanh.f32 %v807_v5 }
  0xf4   :  { %4503 = vtanh.f32 %v814_v56 }
  0xf5   :  { %v3999_v52 = vpop.f32.mrb[10].mxu0 }
  0xf6   :  { %v5157_v28 = vadd.f32 %v3999_v52, %v740_v18  ;;  %v341_v55 = vpop.f32.mrb[11].mxu0 }
  0xf7   :  { %v4490_v62 = vpop.eup %4489  ;;  %v815_v2 = vadd.f32 %v740_v18, %v341_v55 }
  0xf8   :  { %v4492_v3 = vpop.eup %4491 }
  0xf9   :  { %4505 = vtanh.f32 %v815_v2  ;;  %v4370_v10 = vpack.c.bf16 %v4490_v62, %v4492_v3  ;;  %v4002_v4 = vpop.f32.mrb[12].mxu0  ;;  %v4494_v63 = vpop.eup %4493 }
  0xfa   :  { %v818_v32 = vadd.f32 %v4002_v4, %v744_v8  ;;  %v351_v42 = vpop.f32.mrb[13].mxu0  ;;  %v4496_v18 = vpop.eup %4495 }
  0xfb   :  { %4372 = vmatpush3.bf16.xpose.msk.msra.mxu1 %vm5161_vm4, %v4370_v10  ;;  %v817_v5 = vadd.f32 %v744_v8, %v351_v42  ;;  %v4498_v56 = vpop.eup %4497  ;;  %v4374_v60 = vpack.c.bf16 %v4496_v18, %v4494_v63 }
  0xfc   :  { %4507 = vtanh.f32 %v818_v32  ;;  %4069 = vmatprep.subr.mxu1 %v5918_v12  ;;  %v4500_v45 = vpop.eup %4499 }
  0xfd   :  { %4509 = vtanh.f32 %v817_v5  ;;  %v4005_v58 = vpop.f32.mrb[14].mxu0  ;;  %v4378_v2 = vpack.c.bf16 %v4498_v56, %v4500_v45  ;;  %v4502_v3 = vpop.eup %4501 }
  0xfe   :  { %v820_v52 = vadd.f32 %v4005_v58, %v748_v54  ;;  %v361_v55 = vpop.f32.mrb[15].mxu0  ;;  %v5172_v10 = vpop.eup %4503  ;;  %4511 = vtanh.f32 %v5129_v36 }
  0xff   :  { %v5170_v62 = vadd.f32 %v744_v8, %v361_v55  ;;  %v5183_v8 = vld [vmem:[%s5912_s5] sm:$0x1] }
 0x100   :  { %4513 = vtanh.f32 %v820_v52 }
 0x101   :  { %v4008_v4 = vpop.f32.mrb[16].mxu0 }
 0x102   :  { %v5174_v42 = vadd.f32 %v4008_v4, %v748_v54  ;;  %v371_v32 = vpop.f32.mrb[17].mxu0 }
 0x103   :  { %v5176_v39 = vpop.eup %4505  ;;  %4070 = vmatpush3.xpose.msk.msra.mxu1 %vm902_vm3, %v4502_v3  ;;  %v821_v63 = vadd.f32 %v748_v54, %v371_v32 }
 0x104   :  { %4373 = vmatprep.subr.bf16.mxu1 %v5916_v11 }
 0x105   :  { %4515 = vtanh.f32 %v821_v63  ;;  %v4011_v18 = vpop.f32.mrb[18].mxu0 }
 0x106   :  { %v5188_v56 = vpop.eup %4507  ;;  %4072 = vmatmul.mubr.msk.f32.vlgmr.msra.gmra.mrb[2].mxu1 %vm902_vm3, %v5183_v8  ;;  %v824_v36 = vadd.f32 %v4011_v18, %v5137_v7  ;;  %v381_v54 = vpop.f32.mrb[19].mxu0 }
 0x107   :  { %v5193_v58 = vpop.eup %4509  ;;  %4376 = vmatpush3.bf16.xpose.msk.msra.mxu1 %vm5161_vm4, %v4374_v60  ;;  %v823_v45 = vadd.f32 %v5137_v7, %v381_v54  ;;  %4080 = vmatprep.mubr.msk.f32.mxu1 %vm4720_vm2, %v5918_v12  ;;  %v699_v60 = vrot.slane %v5109_v1, %v5106_v57 }
 0x108   :  { %4517 = vtanh.f32 %v824_v36  ;;  %4078 = vmatprep.subr.mxu1 %v5918_v12  ;;  %v4512_v63 = vpop.eup %4511 }
 0x109   :  { %4519 = vtanh.f32 %v823_v45  ;;  %v4014_v55 = vpop.f32.mrb[20].mxu0  ;;  %v760_v57 = vrot.slane %v699_v60, %v5115_v6  ;;  %v721_v1 = vcombine.high %v699_v60, %v699_v60 }
 0x10a   :  { %v826_v3 = vadd.f32 %v4014_v55, %v5140_v51  ;;  %v391_v4 = vpop.f32.mrb[21].mxu0  ;;  %v5209_v54 = vpop.eup %4513  ;;  %4521 = vtanh.f32 %v5152_v25 }
 0x10b   :  { %v5205_v32 = vadd.f32 %v5137_v7, %v391_v4  ;;  %v768_v60 = vrot.slane %v721_v1, %v5115_v6 }
 0x10c   :  { %4523 = vtanh.f32 %v826_v3 }
 0x10d   :  { %v4017_v18 = vpop.f32.mrb[22].mxu0 }
 0x10e   :  { %v5212_v36 = vadd.f32 %v4017_v18, %v5140_v51  ;;  %v401_v22 = vpop.f32.mrb[23].mxu0 }
 0x10f   :  { %v5214_v15 = vpop.eup %4515  ;;  %4079 = vmatpush3.xpose.msk.msra.mxu1 %vm902_vm3, %v4512_v63  ;;  %v827_v7 = vadd.f32 %v5140_v51, %v401_v22 }
 0x110   :  { %4377 = vmatprep.subr.bf16.mxu1 %v5916_v11 }
 0x111   :  { %4525 = vtanh.f32 %v827_v7  ;;  %v4020_v45 = vpop.f32.mrb[24].mxu0 }
 0x112   :  { %v5223_v55 = vpop.eup %4517  ;;  %4081 = vmatmul.mubr.msk.f32.vlgmr.msra.gmra.mrb[4].mxu1 %vm902_vm3, %v5183_v8  ;;  %v830_v25 = vadd.f32 %v4020_v45, %v760_v57  ;;  %v411_v4 = vpop.f32.mrb[25].mxu0 }
 0x113   :  { %v5227_v63 = vpop.eup %4519  ;;  %4380 = vmatpush3.bf16.xpose.msk.msra.mxu1 %vm5161_vm4, %v4378_v2  ;;  %v829_v22 = vadd.f32 %v760_v57, %v411_v4  ;;  %4089 = vmatprep.mubr.msk.f32.mxu1 %vm4720_vm2, %v5918_v12 }
 0x114   :  { %4527 = vtanh.f32 %v830_v25  ;;  %4087 = vmatprep.subr.mxu1 %v5918_v12  ;;  %v4522_v52 = vpop.eup %4521 }
 0x115   :  { %4529 = vtanh.f32 %v829_v22  ;;  %v4023_v3 = vpop.f32.mrb[26].mxu0 }
 0x116   :  { %v832_v18 = vadd.f32 %v4023_v3, %v5125_v0  ;;  %v421_v7 = vpop.f32.mrb[27].mxu0  ;;  %v5237_v2 = vpop.eup %4523  ;;  %4531 = vtanh.f32 %v5157_v28  ;;  %v5922_v3 = vmov 0.0|0.0  }
 0x117   :  { %v831_v45 = vadd.f32 %v760_v57, %v421_v7 }
 0x118   :  { %4533 = vtanh.f32 %v832_v18 }
 0x119   :  { %v4026_v5 = vpop.f32.mrb[28].mxu0 }
 0x11a   :  { %v5240_v4 = vadd.f32 %v4026_v5, %v5125_v0  ;;  %v431_v25 = vpop.f32.mrb[29].mxu0 }
 0x11b   :  { %v5242_v11 = vpop.eup %4525  ;;  %4088 = vmatpush3.xpose.msk.msra.mxu1 %vm902_vm3, %v4522_v52  ;;  %v833_v22 = vadd.f32 %v5125_v0, %v431_v25  ;;  %v5923_v0 = vpack.c.bf16 %v5176_v39, %v5172_v10  ;;  %v5924_v52 = vmov 0.0  }
 0x11c   :  { %4381 = vmatprep.subr.bf16.mxu1 %v5922_v3  ;;  %v4398_v57 = vpack.c.bf16 %v5242_v11, %v5237_v2 }
 0x11d   :  { %4535 = vtanh.f32 %v833_v22  ;;  %v4029_v5 = vpop.f32.mrb[30].mxu0 }
 0x11e   :  { %v4528_v7 = vpop.eup %4527  ;;  %4090 = vmatmul.mubr.msk.f32.vlgmr.msra.gmra.mrb[6].mxu1 %vm902_vm3, %v5183_v8  ;;  %v836_v51 = vadd.f32 %v4029_v5, %v768_v60  ;;  %v441_v28 = vpop.f32.mrb[31].mxu0  ;;  %4537 = vtanh.f32 %v831_v45 }
 0x11f   :  { %v4530_v12 = vpop.eup %4529  ;;  %4384 = vmatpush3.bf16.xpose.msk.msra.mxu1 %vm5161_vm4, %v5923_v0  ;;  %v835_v6 = vadd.f32 %v768_v60, %v441_v28  ;;  %4098 = vmatprep.mubr.msk.f32.mxu1 %vm4720_vm2, %v5924_v52 }
 0x120   :  { %4539 = vtanh.f32 %v836_v51  ;;  %v4402_v1 = vpack.c.bf16 %v4528_v7, %v4530_v12  ;;  %4096 = vmatprep.subr.mxu1 %v5924_v52  ;;  %v4532_v39 = vpop.eup %4531 }
 0x121   :  { %4541 = vtanh.f32 %v835_v6  ;;  %v4032_v18 = vpop.f32.mrb[32].mxu0 }
 0x122   :  { %v838_v25 = vadd.f32 %v4032_v18, %v5143_v48  ;;  %v451_v22 = vpop.f32.mrb[33].mxu0  ;;  %4404 = vmatpush3.bf16.xpose.msk.msra.mxu0 %vm5161_vm4, %v4402_v1  ;;  %v5265_v5 = vpop.eup %4533  ;;  %4543 = vtanh.f32 %v5170_v62 }
 0x123   :  { %v837_v10 = vadd.f32 %v768_v60, %v451_v22  ;;  %4141 = vmatprep.subr.mxu0 %v5924_v52 }
 0x124   :  { %4545 = vtanh.f32 %v838_v25 }
 0x125   :  { %v4035_v45 = vpop.f32.mrb[34].mxu0 }
 0x126   :  { %v5268_v51 = vadd.f32 %v4035_v45, %v5143_v48  ;;  %v461_v12 = vpop.f32.mrb[35].mxu0 }
 0x127   :  { %v5270_v7 = vpop.eup %4535  ;;  %4097 = vmatpush3.xpose.msk.msra.mxu1 %vm902_vm3, %v4532_v39  ;;  %v839_v28 = vadd.f32 %v5143_v48, %v461_v12  ;;  %v5925_v48 = vpack.c.bf16 %v5188_v56, %v5193_v58 }
 0x128   :  { %4385 = vmatprep.subr.bf16.mxu1 %v5922_v3  ;;  %v4406_v60 = vpack.c.bf16 %v5270_v7, %v5265_v5  ;;  %v4538_v0 = vpop.eup %4537 }
 0x129   :  { %4547 = vtanh.f32 %v839_v28  ;;  %v4038_v6 = vpop.f32.mrb[36].mxu0 }
 0x12a   :  { %v4540_v1 = vpop.eup %4539  ;;  %4099 = vmatmul.mubr.msk.f32.vlgmr.msra.gmra.mrb[8].mxu1 %vm902_vm3, %v5183_v8  ;;  %v842_v18 = vadd.f32 %v4038_v6, %v5133_v61  ;;  %v471_v62 = vpop.f32.mrb[37].mxu0  ;;  %4142 = vmatpush3.xpose.msk.msra.mxu0 %vm902_vm3, %v4538_v0  ;;  %4549 = vtanh.f32 %v837_v10 }
 0x12b   :  { %v4542_v22 = vpop.eup %4541  ;;  %4388 = vmatpush3.bf16.xpose.msk.msra.mxu1 %vm5161_vm4, %v5925_v48  ;;  %v841_v25 = vadd.f32 %v5133_v61, %v471_v62  ;;  %4409 = vmatprep.subr.bf16.mxu0 %v5922_v3 }
 0x12c   :  { %4551 = vtanh.f32 %v842_v18  ;;  %v4410_v39 = vpack.c.bf16 %v4540_v1, %v4542_v22  ;;  %4105 = vmatprep.subr.mxu1 %v5924_v52  ;;  %4107 = vmatprep.mubr.msk.f32.mxu1 %vm4720_vm2, %v5924_v52  ;;  %v4544_v12 = vpop.eup %4543 }
 0x12d   :  { %4553 = vtanh.f32 %v841_v25  ;;  %v4041_v45 = vpop.f32.mrb[38].mxu0  ;;  %4144 = vmatmul.mubr.msk.f32.vlgmr.msra.gmra.mrb[48].mxu0 %vm902_vm3, %v5183_v8 }
 0x12e   :  { %v844_v56 = vadd.f32 %v4041_v45, %v5147_v19  ;;  %v481_v58 = vpop.f32.mrb[39].mxu0  ;;  %4412 = vmatpush3.bf16.xpose.msk.msra.mxu0 %vm5161_vm4, %v4410_v39  ;;  %4161 = vmatprep.mubr.msk.f32.mxu0 %vm4720_vm2, %v5924_v52  ;;  %v5301_v0 = vpop.eup %4545  ;;  %4555 = vtanh.f32 %v5174_v42 }
 0x12f   :  { %v843_v10 = vadd.f32 %v5133_v61, %v481_v58  ;;  %4159 = vmatprep.subr.mxu0 %v5924_v52 }
 0x130   :  { %4557 = vtanh.f32 %v844_v56 }
 0x131   :  { %v4044_v28 = vpop.f32.mrb[40].mxu0 }
 0x132   :  { %v5304_v6 = vadd.f32 %v4044_v28, %v5147_v19  ;;  %v491_v1 = vpop.f32.mrb[41].mxu0 }
 0x133   :  { %v5306_v18 = vpop.eup %4547  ;;  %4106 = vmatpush3.xpose.msk.msra.mxu1 %vm902_vm3, %v4544_v12  ;;  %v845_v62 = vadd.f32 %v5147_v19, %v491_v1  ;;  %v5926_v19 = vpack.c.bf16 %v5214_v15, %v5209_v54 }
 0x134   :  { %4389 = vmatprep.subr.bf16.mxu1 %v5922_v3  ;;  %v4414_v61 = vpack.c.bf16 %v5306_v18, %v5301_v0  ;;  %v4550_v22 = vpop.eup %4549 }
 0x135   :  { %4559 = vtanh.f32 %v845_v62  ;;  %v4047_v48 = vpop.f32.mrb[42].mxu0 }
 0x136   :  { %v4552_v25 = vpop.eup %4551  ;;  %4108 = vmatmul.mubr.msk.f32.vlgmr.msra.gmra.mrb[10].mxu1 %vm902_vm3, %v5183_v8  ;;  %v848_v39 = vadd.f32 %v4047_v48, %v5150_v29  ;;  %v501_v42 = vpop.f32.mrb[43].mxu0  ;;  %4160 = vmatpush3.xpose.msk.msra.mxu0 %vm902_vm3, %v4550_v22  ;;  %4561 = vtanh.f32 %v843_v10 }
 0x137   :  { %v4554_v45 = vpop.eup %4553  ;;  %4392 = vmatpush3.bf16.xpose.msk.msra.mxu1 %vm5161_vm4, %v5926_v19  ;;  %v847_v56 = vadd.f32 %v5150_v29, %v501_v42  ;;  %4417 = vmatprep.subr.bf16.mxu0 %v5922_v3 }
 0x138   :  { %4563 = vtanh.f32 %v848_v39  ;;  %v4418_v58 = vpack.c.bf16 %v4552_v25, %v4554_v45  ;;  %4114 = vmatprep.subr.mxu1 %v5924_v52  ;;  %4116 = vmatprep.mubr.msk.f32.mxu1 %vm4720_vm2, %v5924_v52  ;;  %v4556_v28 = vpop.eup %4555 }
 0x139   :  { %4565 = vtanh.f32 %v847_v56  ;;  %v4050_v12 = vpop.f32.mrb[44].mxu0  ;;  %4162 = vmatmul.mubr.msk.f32.vlgmr.msra.gmra.mrb[50].mxu0 %vm902_vm3, %v5183_v8 }
 0x13a   :  { %v850_v15 = vadd.f32 %v4050_v12, %v5155_v59  ;;  %v511_v54 = vpop.f32.mrb[45].mxu0  ;;  %4420 = vmatpush3.bf16.xpose.msk.msra.mxu0 %vm5161_vm4, %v4418_v58  ;;  %4179 = vmatprep.mubr.msk.f32.mxu0 %vm4720_vm2, %v5924_v52  ;;  %v5337_v62 = vpop.eup %4557  ;;  %4567 = vtanh.f32 %v5205_v32  ;;  %v5927_v32 = vpack.c.bf16 %v5223_v55, %v5227_v63 }
 0x13b   :  { %v849_v10 = vadd.f32 %v5150_v29, %v511_v54  ;;  %4177 = vmatprep.subr.mxu0 %v5924_v52 }
 0x13c   :  { %4569 = vtanh.f32 %v850_v15 }
 0x13d   :  { %v4053_v1 = vpop.f32.mrb[46].mxu0 }
 0x13e   :  { %v5340_v22 = vadd.f32 %v4053_v1, %v5155_v59  ;;  %v521_v48 = vpop.f32.mrb[47].mxu0 }
 0x13f   :  { %v5342_v25 = vpop.eup %4559  ;;  %4115 = vmatpush3.xpose.msk.msra.mxu1 %vm902_vm3, %v4556_v28  ;;  %v851_v39 = vadd.f32 %v5155_v59, %v521_v48 }
 0x140   :  { %4393 = vmatprep.subr.bf16.mxu1 %v5922_v3  ;;  %v4422_v29 = vpack.c.bf16 %v5342_v25, %v5337_v62  ;;  %v4562_v42 = vpop.eup %4561 }
 0x141   :  { %4571 = vtanh.f32 %v851_v39 }
 0x142   :  { %v4564_v45 = vpop.eup %4563  ;;  %4117 = vmatmul.mubr.msk.f32.vlgmr.msra.gmra.mrb[12].mxu1 %vm902_vm3, %v5183_v8  ;;  %4178 = vmatpush3.xpose.msk.msra.mxu0 %vm902_vm3, %v4562_v42  ;;  %4573 = vtanh.f32 %v849_v10 }
 0x143   :  { %v4566_v19 = vpop.eup %4565  ;;  %4396 = vmatpush3.bf16.xpose.msk.msra.mxu1 %vm5161_vm4, %v5927_v32  ;;  %4425 = vmatprep.subr.bf16.mxu0 %v5922_v3  ;;  %4575 = vtanh.f32 %v5212_v36  ;;  %v5928_v36 = vpack.c.bf16 %v4803_v14, %v4798_v13 }
 0x144   :  { %v4426_v59 = vpack.c.bf16 %v4564_v45, %v4566_v19  ;;  %4123 = vmatprep.subr.mxu1 %v5924_v52  ;;  %4125 = vmatprep.mubr.msk.f32.mxu1 %vm4720_vm2, %v5924_v52  ;;  %v4568_v55 = vpop.eup %4567  ;;  %4577 = vtanh.f32 %v5240_v4  ;;  %v5929_v4 = vpack.c.bf16 %v4832_v21, %v4827_v20 }
 0x145   :  { %4180 = vmatmul.mubr.msk.f32.vlgmr.msra.gmra.mrb[52].mxu0 %vm902_vm3, %v5183_v8  ;;  %4579 = vtanh.f32 %v5268_v51 }
 0x146   :  { %4428 = vmatpush3.bf16.xpose.msk.msra.mxu0 %vm5161_vm4, %v4426_v59  ;;  %4197 = vmatprep.mubr.msk.f32.mxu0 %vm4720_vm2, %v5924_v52  ;;  %v4570_v63 = vpop.eup %4569  ;;  %4581 = vtanh.f32 %v5304_v6 }
 0x147   :  { %4195 = vmatprep.subr.mxu0 %v5924_v52  ;;  %4583 = vtanh.f32 %v5340_v22 }
 0x14b   :  { %v4572_v56 = vpop.eup %4571  ;;  %4124 = vmatpush3.xpose.msk.msra.mxu1 %vm902_vm3, %v4568_v55 }
 0x14c   :  { %4397 = vmatprep.subr.bf16.mxu1 %v5922_v3  ;;  %v4430_v58 = vpack.c.bf16 %v4572_v56, %v4570_v63  ;;  %v4574_v12 = vpop.eup %4573 }
 0x14d   :  { %v4576_v11 = vpop.eup %4575 }
 0x14e   :  { %4126 = vmatmul.mubr.msk.f32.vlgmr.msra.gmra.mrb[14].mxu1 %vm902_vm3, %v5183_v8  ;;  %4196 = vmatpush3.xpose.msk.msra.mxu0 %vm902_vm3, %v4574_v12  ;;  %v4578_v13 = vpop.eup %4577 }
 0x14f   :  { %4400 = vmatpush3.bf16.xpose.msk.msra.mxu1 %vm5161_vm4, %v4398_v57  ;;  %4134 = vmatprep.mubr.msk.f32.mxu1 %vm4720_vm2, %v5924_v52  ;;  %v4580_v14 = vpop.eup %4579  ;;  %v5453_v57 = vand.u32 127, %v5930_v9 }
 0x150   :  { %4132 = vmatprep.subr.mxu1 %v5924_v52  ;;  %4433 = vmatprep.subr.bf16.mxu0 %v5922_v3 }
 0x151   :  { %4198 = vmatmul.mubr.msk.f32.vlgmr.msra.gmra.mrb[54].mxu0 %vm902_vm3, %v5183_v8  ;;  %vm2172_vm5 = vcmp.lt.s32.totalorder %v5453_v57, 20 }
 0x152   :  { %4435 = vmatpush3.bf16.msra.mxu0 %v5928_v36  ;;  %4215 = vmatprep.mubr.msk.f32.mxu0 %vm4720_vm2, %v5924_v52 }
 0x153   :  { %4213 = vmatprep.subr.mxu0 %v5924_v52 }
 0x156   :  { %4214 = vmatpush3.msra.mxu0 %v4888_v35  ;;  %v4582_v35 = vpop.eup %4581 }
 0x157   :  { %4133 = vmatpush3.xpose.msk.msra.mxu1 %vm902_vm3, %v4576_v11  ;;  %4436 = vmatprep.subr.bf16.mxu0 %v5922_v3  ;;  %v4584_v2 = vpop.eup %4583 }
 0x158   :  { %4405 = vmatprep.subr.bf16.mxu1 %v5922_v3 }
 0x15a   :  { %4135 = vmatmul.mubr.msk.f32.vlgmr.msra.gmra.mrb[16].mxu1 %vm902_vm3, %v5183_v8 }
 0x15b   :  { %4408 = vmatpush3.bf16.xpose.msk.msra.mxu1 %vm5161_vm4, %v4406_v60  ;;  %4152 = vmatprep.mubr.msk.f32.mxu1 %vm4720_vm2, %v5924_v52 }
 0x15c   :  { %4150 = vmatprep.subr.mxu1 %v5924_v52 }
 0x163   :  { %4151 = vmatpush3.xpose.msk.msra.mxu1 %vm902_vm3, %v4578_v13 }
 0x164   :  { %4413 = vmatprep.subr.bf16.mxu1 %v5922_v3 }
 0x166   :  { %4153 = vmatmul.mubr.msk.f32.vlgmr.msra.gmra.mrb[18].mxu1 %vm902_vm3, %v5183_v8 }
 0x167   :  { %4416 = vmatpush3.bf16.xpose.msk.msra.mxu1 %vm5161_vm4, %v4414_v61  ;;  %4170 = vmatprep.mubr.msk.f32.mxu1 %vm4720_vm2, %v5924_v52 }
 0x168   :  { %4168 = vmatprep.subr.mxu1 %v5924_v52 }
 0x16f   :  { %4169 = vmatpush3.xpose.msk.msra.mxu1 %vm902_vm3, %v4580_v14 }
 0x170   :  { %4421 = vmatprep.subr.bf16.mxu1 %v5922_v3 }
 0x172   :  { %4171 = vmatmul.mubr.msk.f32.vlgmr.msra.gmra.mrb[20].mxu1 %vm902_vm3, %v5183_v8 }
 0x173   :  { %4424 = vmatpush3.bf16.xpose.msk.msra.mxu1 %vm5161_vm4, %v4422_v29  ;;  %4188 = vmatprep.mubr.msk.f32.mxu1 %vm4720_vm2, %v5924_v52 }
 0x174   :  { %4186 = vmatprep.subr.mxu1 %v5924_v52 }
 0x17b   :  { %4187 = vmatpush3.xpose.msk.msra.mxu1 %vm902_vm3, %v4582_v35 }
 0x17c   :  { %4429 = vmatprep.subr.bf16.mxu1 %v5922_v3 }
 0x17e   :  { %4189 = vmatmul.mubr.msk.f32.vlgmr.msra.gmra.mrb[22].mxu1 %vm902_vm3, %v5183_v8 }
 0x17f   :  { %4432 = vmatpush3.bf16.xpose.msk.msra.mxu1 %vm5161_vm4, %v4430_v58  ;;  %4206 = vmatprep.mubr.msk.f32.mxu1 %vm4720_vm2, %v5924_v52 }
 0x180   :  { %4204 = vmatprep.subr.mxu1 %v5924_v52 }
 0x187   :  { %4205 = vmatpush3.xpose.msk.msra.mxu1 %vm902_vm3, %v4584_v2 }
 0x188   :  { %4439 = vmatprep.subr.bf16.mxu1 %v5922_v3 }
 0x18a   :  { %4207 = vmatmul.mubr.msk.f32.vlgmr.msra.gmra.mrb[24].mxu1 %vm902_vm3, %v5183_v8 }
 0x18b   :  { %4441 = vmatpush3.bf16.msra.mxu1 %v5929_v4  ;;  %4233 = vmatprep.mubr.msk.f32.mxu1 %vm4720_vm2, %v5924_v52 }
 0x18c   :  { %4231 = vmatprep.subr.mxu1 %v5924_v52 }
 0x18f   :  { %4232 = vmatpush3.msra.mxu1 %v4970_v53 }
 0x190   :  { %4445 = vmatprep.subr.bf16.mxu1 %v5922_v3 }
 0x1d9   :  { %v981_v8 = vpop.f32.mrb[2].mxu1 }
 0x1da   :  { %v5458_v20 = vsel %vm2172_vm5, %v981_v8, -1e+30  ;;  %v4073_v21 = vpop.f32.mrb[3].mxu1 }
 0x1db   :  { %v2190_v5 = vsel %vm2189_vm6, %v5458_v20, -inf }
 0x1dc   :  { %2191 = vmax.xlane.f32.xlu0 %v2190_v5 }
 0x1e5   :  { %v1060_v51 = vpop.f32.mrb[4].mxu1 }
 0x1e6   :  { %v5464_v53 = vsel %vm2172_vm5, %v1060_v51, -1e+30  ;;  %v4082_v7 = vpop.f32.mrb[5].mxu1 }
 0x1e7   :  { %v2193_v60 = vsel %vm2189_vm6, %v5464_v53, -inf }
 0x1e8   :  { %2194 = vmax.xlane.f32.xlu0 %v2193_v60 }
 0x1f1   :  { %v1139_v0 = vpop.f32.mrb[6].mxu1 }
 0x1f2   :  { %v5470_v6 = vsel %vm2172_vm5, %v1139_v0, -1e+30  ;;  %v4091_v18 = vpop.f32.mrb[7].mxu1 }
 0x1f3   :  { %v2196_v61 = vsel %vm2189_vm6, %v5470_v6, -inf }
 0x1f4   :  { %2197 = vmax.xlane.f32.xlu1 %v2196_v61 }
 0x1fd   :  { %v1218_v15 = vpop.f32.mrb[8].mxu1 }
 0x1fe   :  { %v5476_v54 = vsel %vm2172_vm5, %v1218_v15, -1e+30  ;;  %v4100_v10 = vpop.f32.mrb[9].mxu1 }
 0x1ff   :  { %v2199_v28 = vsel %vm2189_vm6, %v5476_v54, -inf }
 0x200   :  { %2200 = vmax.xlane.f32.xlu1 %v2199_v28  ;;  %v1613_v1 = vpop.f32.mrb[48].mxu0 }
 0x201   :  { %v4145_v62 = vpop.f32.mrb[49].mxu0  ;;  %v5498_v12 = vsel %vm2172_vm5, %v1613_v1, -1e+30 }
 0x202   :  { %v2214_v14 = vsel %vm2189_vm6, %v5498_v12, -inf }
 0x209   :  { %v1297_v22 = vpop.f32.mrb[10].mxu1 }
 0x20a   :  { %v5482_v48 = vsel %vm2172_vm5, %v1297_v22, -1e+30  ;;  %v4109_v25 = vpop.f32.mrb[11].mxu1 }
 0x20b   :  { %v2202_v39 = vsel %vm2189_vm6, %v5482_v48, -inf }
 0x20c   :  { %2203 = vmax.xlane.f32.xlu0 %v2202_v39  ;;  %v1771_v29 = vpop.f32.mrb[50].mxu0 }
 0x20d   :  { %v4163_v42 = vpop.f32.mrb[51].mxu0  ;;  %v5506_v2 = vsel %vm2172_vm5, %v1771_v29, -1e+30 }
 0x20e   :  { %v2220_v4 = vsel %vm2189_vm6, %v5506_v2, -inf }
 0x215   :  { %v1376_v45 = vpop.f32.mrb[12].mxu1 }
 0x216   :  { %v5488_v19 = vsel %vm2172_vm5, %v1376_v45, -1e+30  ;;  %v4118_v32 = vpop.f32.mrb[13].mxu1 }
 0x217   :  { %v2205_v59 = vsel %vm2189_vm6, %v5488_v19, -inf }
 0x218   :  { %2206 = vmax.xlane.f32.xlu1 %v2205_v59  ;;  %v1929_v55 = vpop.f32.mrb[52].mxu0 }
 0x219   :  { %v4181_v63 = vpop.f32.mrb[53].mxu0  ;;  %v5512_v9 = vsel %vm2172_vm5, %v1929_v55, -1e+30 }
 0x21a   :  { %v2226_v21 = vsel %vm2189_vm6, %v5512_v9, -inf }
 0x221   :  { %v1455_v56 = vpop.f32.mrb[14].mxu1 }
 0x222   :  { %v5494_v58 = vsel %vm2172_vm5, %v1455_v56, -1e+30  ;;  %v4127_v36 = vpop.f32.mrb[15].mxu1 }
 0x223   :  { %v2208_v11 = vsel %vm2189_vm6, %v5494_v58, -inf }
 0x224   :  { %2209 = vmax.xlane.f32.xlu0 %v2208_v11  ;;  %v2087_v13 = vpop.f32.mrb[54].mxu0 }
 0x225   :  { %v4199_v35 = vpop.f32.mrb[55].mxu0  ;;  %v5522_v51 = vsel %vm2172_vm5, %v2087_v13, -1e+30 }
 0x226   :  { %v2232_v0 = vsel %vm2189_vm6, %v5522_v51, -inf }
 0x228   :  { %2215 = vmax.xlane.f32.xlu0 %v2214_v14 }
 0x22c   :  { %2221 = vmax.xlane.f32.xlu0 %v2220_v4 }
 0x22d   :  { %v1534_v8 = vpop.f32.mrb[16].mxu1 }
 0x22e   :  { %v5518_v5 = vsel %vm2172_vm5, %v1534_v8, -1e+30  ;;  %v4136_v7 = vpop.f32.mrb[17].mxu1 }
 0x22f   :  { %v2211_v60 = vsel %vm2189_vm6, %v5518_v5, -inf }
 0x230   :  { %2212 = vmax.xlane.f32.xlu1 %v2211_v60  ;;  %2227 = vmax.xlane.f32.xlu0 %v2226_v21 }
 0x234   :  { %2233 = vmax.xlane.f32.xlu0 %v2232_v0 }
 0x239   :  { %v1692_v18 = vpop.f32.mrb[18].mxu1 }
 0x23a   :  { %v5530_v61 = vsel %vm2172_vm5, %v1692_v18, -1e+30  ;;  %v4154_v15 = vpop.f32.mrb[19].mxu1 }
 0x23b   :  { %v2217_v10 = vsel %vm2189_vm6, %v5530_v61, -inf }
 0x23c   :  { %2218 = vmax.xlane.f32.xlu1 %v2217_v10 }
 0x245   :  { %v1850_v28 = vpop.f32.mrb[20].mxu1 }
 0x246   :  { %v5536_v1 = vsel %vm2172_vm5, %v1850_v28, -1e+30  ;;  %v4172_v62 = vpop.f32.mrb[21].mxu1 }
 0x247   :  { %v2223_v22 = vsel %vm2189_vm6, %v5536_v1, -inf }
 0x248   :  { %2224 = vmax.xlane.f32.xlu1 %v2223_v22 }
 0x251   :  { %v2008_v25 = vpop.f32.mrb[22].mxu1 }
 0x252   :  { %v5542_v39 = vsel %vm2172_vm5, %v2008_v25, -1e+30  ;;  %v4190_v29 = vpop.f32.mrb[23].mxu1 }
 0x253   :  { %v2229_v42 = vsel %vm2189_vm6, %v5542_v39, -inf }
 0x254   :  { %2230 = vmax.xlane.f32.xlu1 %v2229_v42 }
 0x25d   :  { %v2166_v45 = vpop.f32.mrb[24].mxu1 }
 0x25e   :  { %v5548_v32 = vsel %vm2172_vm5, %v2166_v45, -1e+30  ;;  %v4208_v59 = vpop.f32.mrb[25].mxu1 }
 0x25f   :  { %v2235_v55 = vsel %vm2189_vm6, %v5548_v32, -inf }
 0x260   :  { %2236 = vmax.xlane.f32.xlu1 %v2235_v55 }
 0x269   :  { %v2192_v63 = vpop.xlane.xlu0 %2191 }
 0x26a   :  { %v2238_v56 = vsub.f32 %v5458_v20, %v2192_v63 }
 0x26c   :  { %v2254_v36 = vmul.f32 1.442695, %v2238_v56 }
 0x26e   :  { %4585 = vpow2.f32 %v2254_v36 }
 0x275   :  { %v2195_v11 = vpop.xlane.xlu0 %2194 }
 0x276   :  { %v2239_v13 = vsub.f32 %v5464_v53, %v2195_v11 }
 0x278   :  { %v5554_v14 = vpop.eup %4585  ;;  %v2256_v35 = vmul.f32 1.442695, %v2239_v13 }
 0x279   :  { %v2286_v57 = vsel %vm2189_vm6, %v5554_v14, 0.0 }
 0x27a   :  { %4587 = vpow2.f32 %v2256_v35  ;;  %2287 = vadd.xlane.f32.xlu0 %v2286_v57 }
 0x281   :  { %v2198_v4 = vpop.xlane.xlu1 %2197 }
 0x282   :  { %v2240_v8 = vsub.f32 %v5470_v6, %v2198_v4 }
 0x284   :  { %v5559_v21 = vpop.eup %4587  ;;  %v2258_v7 = vmul.f32 1.442695, %v2240_v8 }
 0x285   :  { %v2289_v20 = vsel %vm2189_vm6, %v5559_v21, 0.0 }
 0x286   :  { %4589 = vpow2.f32 %v2258_v7  ;;  %2290 = vadd.xlane.f32.xlu1 %v2289_v20 }
 0x28d   :  { %v2201_v53 = vpop.xlane.xlu1 %2200 }
 0x28e   :  { %v2241_v60 = vsub.f32 %v5476_v54, %v2201_v53 }
 0x290   :  { %v5564_v0 = vpop.eup %4589  ;;  %v2260_v18 = vmul.f32 1.442695, %v2241_v60 }
 0x291   :  { %v2292_v15 = vsel %vm2189_vm6, %v5564_v0, 0.0 }
 0x292   :  { %4591 = vpow2.f32 %v2260_v18  ;;  %2293 = vadd.xlane.f32.xlu0 %v2292_v15 }
 0x299   :  { %v2204_v6 = vpop.xlane.xlu0 %2203 }
 0x29a   :  { %v2242_v10 = vsub.f32 %v5482_v48, %v2204_v6 }
 0x29c   :  { %v5569_v28 = vpop.eup %4591  ;;  %v2262_v62 = vmul.f32 1.442695, %v2242_v10 }
 0x29d   :  { %v2295_v22 = vsel %vm2189_vm6, %v5569_v28, 0.0 }
 0x29e   :  { %4593 = vpow2.f32 %v2262_v62  ;;  %2296 = vadd.xlane.f32.xlu1 %v2295_v22 }
 0x2a5   :  { %v2207_v54 = vpop.xlane.xlu1 %2206 }
 0x2a6   :  { %v2243_v25 = vsub.f32 %v5488_v19, %v2207_v54 }
 0x2a8   :  { %v5574_v29 = vpop.eup %4593  ;;  %v2264_v42 = vmul.f32 1.442695, %v2243_v25 }
 0x2a9   :  { %v2298_v45 = vsel %vm2189_vm6, %v5574_v29, 0.0 }
 0x2aa   :  { %4595 = vpow2.f32 %v2264_v42  ;;  %2299 = vadd.xlane.f32.xlu0 %v2298_v45 }
 0x2b1   :  { %v2210_v48 = vpop.xlane.xlu0 %2209 }
 0x2b2   :  { %v2244_v59 = vsub.f32 %v5494_v58, %v2210_v48 }
 0x2b4   :  { %v5579_v55 = vpop.eup %4595  ;;  %v2266_v63 = vmul.f32 1.442695, %v2244_v59 }
 0x2b5   :  { %v2216_v56 = vpop.xlane.xlu0 %2215  ;;  %v2301_v36 = vsel %vm2189_vm6, %v5579_v55, 0.0 }
 0x2b6   :  { %4597 = vpow2.f32 %v2266_v63  ;;  %v2246_v19 = vsub.f32 %v5498_v12, %v2216_v56  ;;  %2302 = vadd.xlane.f32.xlu1 %v2301_v36 }
 0x2b8   :  { %v2270_v11 = vmul.f32 1.442695, %v2246_v19 }
 0x2b9   :  { %v2222_v13 = vpop.xlane.xlu0 %2221 }
 0x2ba   :  { %4599 = vpow2.f32 %v2270_v11  ;;  %v2248_v35 = vsub.f32 %v5506_v2, %v2222_v13 }
 0x2bc   :  { %v2274_v57 = vmul.f32 1.442695, %v2248_v35 }
 0x2bd   :  { %v2213_v4 = vpop.xlane.xlu1 %2212  ;;  %v2228_v8 = vpop.xlane.xlu0 %2227 }
 0x2be   :  { %4601 = vpow2.f32 %v2274_v57  ;;  %v2245_v58 = vsub.f32 %v5518_v5, %v2213_v4  ;;  %v2250_v7 = vsub.f32 %v5512_v9, %v2228_v8 }
 0x2c0   :  { %v5587_v20 = vpop.eup %4597  ;;  %v2268_v53 = vmul.f32 1.442695, %v2245_v58  ;;  %v2278_v60 = vmul.f32 1.442695, %v2250_v7 }
 0x2c1   :  { %v2234_v18 = vpop.xlane.xlu0 %2233  ;;  %v2304_v12 = vsel %vm2189_vm6, %v5587_v20, 0.0 }
 0x2c2   :  { %4603 = vpow2.f32 %v2268_v53  ;;  %v2252_v15 = vsub.f32 %v5522_v51, %v2234_v18  ;;  %2305 = vadd.xlane.f32.xlu0 %v2304_v12 }
 0x2c3   :  { %4605 = vpow2.f32 %v2278_v60 }
 0x2c4   :  { %v5592_v2 = vpop.eup %4599  ;;  %v2282_v6 = vmul.f32 1.442695, %v2252_v15 }
 0x2c5   :  { %v2310_v5 = vsel %vm2189_vm6, %v5592_v2, 0.0 }
 0x2c6   :  { %4607 = vpow2.f32 %v2282_v6  ;;  %2311 = vadd.xlane.f32.xlu0 %v2310_v5  ;;  %v5931_v6 = vpack.c.bf16 %v4815_v17, %v4810_v16  ;;  %v4649_v5 = vld [vmem:[%s5908_s1 + $0x28] sm:$0xff]  ;;  %v5932_v17 = vpack.c.bf16 %v4844_v24, %v4839_v23  ;;  %v5933_v24 = vpack.c.bf16 %v4856_v27, %v4851_v26 }
 0x2c7   :  { %v5934_v26 = vpack.c.bf16 %v4871_v31, %v4866_v30  ;;  %v4652_v27 = vld [vmem:[%s5908_s1 + $0x88] sm:$0xff]  ;;  %v5935_v30 = vpack.c.bf16 %v4883_v34, %v4878_v33  ;;  %v4653_v31 = vld [vmem:[%s5908_s1 + $0xa0] sm:$0xff]  ;;  %v5936_v33 = vpack.c.bf16 %v4900_v38, %v4895_v37 }
 0x2c8   :  { %v5596_v9 = vpop.eup %4601 }
 0x2c9   :  { %v2219_v10 = vpop.xlane.xlu1 %2218  ;;  %v2316_v62 = vsel %vm2189_vm6, %v5596_v9, 0.0 }
 0x2ca   :  { %v2247_v22 = vsub.f32 %v5530_v61, %v2219_v10  ;;  %2317 = vadd.xlane.f32.xlu0 %v2316_v62 }
 0x2cc   :  { %v5601_v51 = vpop.eup %4603  ;;  %v2272_v54 = vmul.f32 1.442695, %v2247_v22 }
 0x2cd   :  { %v5603_v25 = vpop.eup %4605  ;;  %v2307_v42 = vsel %vm2189_vm6, %v5601_v51, 0.0 }
 0x2ce   :  { %4609 = vpow2.f32 %v2272_v54  ;;  %v2322_v45 = vsel %vm2189_vm6, %v5603_v25, 0.0  ;;  %2308 = vadd.xlane.f32.xlu1 %v2307_v42 }
 0x2cf   :  { %2323 = vadd.xlane.f32.xlu0 %v2322_v45  ;;  %v4651_v45 = vld [vmem:[%s5908_s1 + $0x70] sm:$0xff] }
 0x2d0   :  { %v5609_v48 = vpop.eup %4607 }
 0x2d1   :  { %v2328_v61 = vsel %vm2189_vm6, %v5609_v48, 0.0 }
 0x2d3   :  { %2329 = vadd.xlane.f32.xlu0 %v2328_v61 }
 0x2d5   :  { %v2225_v59 = vpop.xlane.xlu1 %2224 }
 0x2d6   :  { %v2249_v63 = vsub.f32 %v5536_v1, %v2225_v59 }
 0x2d8   :  { %v5614_v56 = vpop.eup %4609  ;;  %v2276_v36 = vmul.f32 1.442695, %v2249_v63 }
 0x2d9   :  { %v2313_v19 = vsel %vm2189_vm6, %v5614_v56, 0.0 }
 0x2da   :  { %4611 = vpow2.f32 %v2276_v36  ;;  %2314 = vadd.xlane.f32.xlu1 %v2313_v19 }
 0x2e1   :  { %v2231_v11 = vpop.xlane.xlu1 %2230 }
 0x2e2   :  { %v2251_v13 = vsub.f32 %v5542_v39, %v2231_v11 }
 0x2e4   :  { %v5619_v35 = vpop.eup %4611  ;;  %v2280_v57 = vmul.f32 1.442695, %v2251_v13 }
 0x2e5   :  { %v2319_v4 = vsel %vm2189_vm6, %v5619_v35, 0.0 }
 0x2e6   :  { %4613 = vpow2.f32 %v2280_v57  ;;  %2320 = vadd.xlane.f32.xlu1 %v2319_v4 }
 0x2ed   :  { %v2237_v1 = vpop.xlane.xlu1 %2236 }
 0x2ee   :  { %v2253_v8 = vsub.f32 %v5548_v32, %v2237_v1 }
 0x2f0   :  { %v5624_v58 = vpop.eup %4613  ;;  %v2284_v7 = vmul.f32 1.442695, %v2253_v8  ;;  %v5937_v8 = vpack.c.bf16 %v4913_v41, %v4908_v40 }
 0x2f1   :  { %v2325_v53 = vsel %vm2189_vm6, %v5624_v58, 0.0 }
 0x2f2   :  { %4615 = vpow2.f32 %v2284_v7  ;;  %2326 = vadd.xlane.f32.xlu1 %v2325_v53  ;;  %v4655_v53 = vld [vmem:[%s5908_s1 + $0xd0] sm:$0xff] }
 0x2fc   :  { %v5628_v39 = vpop.eup %4615 }
 0x2fd   :  { %v2331_v60 = vsel %vm2189_vm6, %v5628_v39, 0.0 }
 0x2fe   :  { %2332 = vadd.xlane.f32.xlu1 %v2331_v60 }
 0x307   :  { %v2288_v18 = vpop.xlane.xlu0 %2287 }
 0x308   :  { %4617 = vrcp.f32 %v2288_v18  ;;  %v5938_v18 = vpack.c.bf16 %v4941_v47, %v4936_v46 }
 0x312   :  { %v4618_v12 = vpop.eup %4617 }
 0x313   :  { %v2350_v32 = vmul.f32 %v4618_v12, %v5554_v14  ;;  %v2291_v15 = vpop.xlane.xlu1 %2290  ;;  %v4656_v12 = vld [vmem:[%s5908_s1 + $0x120] sm:$0xff] }
 0x314   :  { %4619 = vrcp.f32 %v2291_v15 }
 0x315   :  { %4216 = vmatmul.mubr.msk.f32.vlgmr.msra.gmra.mrb[56].mxu0 %vm2366_vm7, %v2350_v32 }
 0x316   :  { %4438 = vmatpush3.bf16.msra.mxu0 %v5931_v6  ;;  %4224 = vmatprep.mubr.msk.f32.mxu0 %vm4720_vm2, %v5924_v52 }
 0x317   :  { %4222 = vmatprep.subr.mxu0 %v5924_v52 }
 0x31a   :  { %4223 = vmatpush3.msra.mxu0 %v4649_v5 }
 0x31b   :  { %4442 = vmatprep.subr.bf16.mxu0 %v5922_v3 }
 0x31e   :  { %v4620_v14 = vpop.eup %4619 }
 0x31f   :  { %v2351_v10 = vmul.f32 %v4620_v14, %v5559_v21  ;;  %v2294_v62 = vpop.xlane.xlu0 %2293  ;;  %v4650_v21 = vld [vmem:[%s5908_s1 + $0x58] sm:$0xff] }
 0x320   :  { %4621 = vrcp.f32 %v2294_v62 }
 0x321   :  { %v3535_v16 = vrot.slane %v2351_v10, 7  ;;  %4225 = vmatmul.mubr.msk.f32.vlgmr.msra.gmra.mrb[58].mxu0 %vm2366_vm7, %v2351_v10 }
 0x322   :  { %4444 = vmatpush3.bf16.msra.mxu0 %v5932_v17  ;;  %4242 = vmatprep.mubr.msk.f32.mxu0 %vm4720_vm2, %v5924_v52  ;;  %v4658_v17 = vld [vmem:[%s5908_s1 + $0x100] sm:$0xff] }
 0x323   :  { %4240 = vmatprep.subr.mxu0 %v5924_v52  ;;  %v5653_v22 = vsel %vm3536_vm8, %v3535_v16, %v2350_v32  ;;  %v4657_v32 = vld [vmem:[%s5908_s1 + $0x128] sm:$0xff] }
 0x324   :  { %v4470_v15 = vpack.c.bf16 %v4657_v32, %v4656_v12 }
 0x326   :  { %4241 = vmatpush3.msra.mxu0 %v4650_v21 }
 0x327   :  { %4448 = vmatprep.subr.bf16.mxu0 %v5922_v3 }
 0x32a   :  { %v4622_v54 = vpop.eup %4621 }
 0x32b   :  { %v5660_v42 = vmul.f32 %v4622_v54, %v5564_v0  ;;  %v2297_v23 = vpop.xlane.xlu1 %2296 }
 0x32c   :  { %4623 = vrcp.f32 %v2297_v23  ;;  %v4659_v23 = vld [vmem:[%s5908_s1 + $0x150] sm:$0xff] }
 0x32d   :  { %4234 = vmatmul.mubr.msk.f32.vlgmr.msra.gmra.mrb[26].mxu1 %vm2366_vm7, %v5660_v42 }
 0x32e   :  { %4447 = vmatpush3.bf16.msra.mxu1 %v5933_v24  ;;  %4251 = vmatprep.mubr.msk.f32.mxu1 %vm4720_vm2, %v5924_v52  ;;  %v4660_v24 = vld [vmem:[%s5908_s1 + $0x158] sm:$0xff] }
 0x32f   :  { %4249 = vmatprep.subr.mxu1 %v5924_v52 }
 0x332   :  { %4250 = vmatpush3.msra.mxu1 %v4651_v45  ;;  %v4476_v45 = vpack.c.bf16 %v4660_v24, %v4659_v23 }
 0x333   :  { %4451 = vmatprep.subr.bf16.mxu1 %v5922_v3 }
 0x336   :  { %v4624_v0 = vpop.eup %4623 }
 0x337   :  { %v5675_v61 = vmul.f32 %v4624_v0, %v5569_v28  ;;  %v2300_v59 = vpop.xlane.xlu0 %2299  ;;  %v5939_v0 = vpack.c.bf16 %v4927_v44, %v4922_v43  ;;  %v4662_v44 = vld [vmem:[%s5908_s1 + $0xe8] sm:$0xff] }
 0x338   :  { %4625 = vrcp.f32 %v2300_v59  ;;  %v4661_v59 = vld [vmem:[%s5908_s1 + $0x130] sm:$0xff] }
 0x339   :  { %4243 = vmatmul.mubr.msk.f32.vlgmr.msra.gmra.mrb[60].mxu0 %vm2366_vm7, %v5675_v61  ;;  %v3541_v60 = vrot.slane %v5675_v61, 5 }
 0x33a   :  { %4450 = vmatpush3.bf16.msra.mxu0 %v5934_v26  ;;  %4260 = vmatprep.mubr.msk.f32.mxu0 %vm4720_vm2, %v5924_v52 }
 0x33b   :  { %4258 = vmatprep.subr.mxu0 %v5924_v52 }
 0x33e   :  { %4259 = vmatpush3.msra.mxu0 %v4652_v27 }
 0x33f   :  { %4454 = vmatprep.subr.bf16.mxu0 %v5922_v3 }
 0x342   :  { %v4626_v28 = vpop.eup %4625 }
 0x343   :  { %v5690_v63 = vmul.f32 %v4626_v28, %v5574_v29  ;;  %v2303_v36 = vpop.xlane.xlu1 %2302 }
 0x344   :  { %4627 = vrcp.f32 %v2303_v36  ;;  %v5940_v36 = vpack.c.bf16 %v4953_v50, %v4948_v49  ;;  %v4666_v49 = vld [vmem:[%s5908_s1 + $0x140] sm:$0xff] }
 0x345   :  { %4252 = vmatmul.mubr.msk.f32.vlgmr.msra.gmra.mrb[28].mxu1 %vm2366_vm7, %v5690_v63 }
 0x346   :  { %4453 = vmatpush3.bf16.msra.mxu1 %v5935_v30  ;;  %4269 = vmatprep.mubr.msk.f32.mxu1 %vm4720_vm2, %v5924_v52  ;;  %v4665_v30 = vld [vmem:[%s5908_s1 + $0x138] sm:$0xff] }
 0x347   :  { %4267 = vmatprep.subr.mxu1 %v5924_v52  ;;  %v4473_v50 = vpack.c.bf16 %v4666_v49, %v4665_v30 }
 0x34a   :  { %4268 = vmatpush3.msra.mxu1 %v4653_v31 }
 0x34b   :  { %4457 = vmatprep.subr.bf16.mxu1 %v5922_v3 }
 0x34e   :  { %v4628_v29 = vpop.eup %4627 }
 0x34f   :  { %v5705_v19 = vmul.f32 %v4628_v29, %v5579_v55  ;;  %v2306_v11 = vpop.xlane.xlu0 %2305  ;;  %v4654_v55 = vld [vmem:[%s5908_s1 + $0xb8] sm:$0xff] }
 0x350   :  { %4629 = vrcp.f32 %v2306_v11 }
 0x351   :  { %4261 = vmatmul.mubr.msk.f32.vlgmr.msra.gmra.mrb[62].mxu0 %vm2366_vm7, %v5705_v19  ;;  %v3547_v6 = vrot.slane %v5705_v19, 3  ;;  %v4667_v19 = vld [vmem:[%s5908_s1 + $0x148] sm:$0xff] }
 0x352   :  { %4456 = vmatpush3.bf16.msra.mxu0 %v5936_v33  ;;  %4278 = vmatprep.mubr.msk.f32.mxu0 %vm4720_vm2, %v5924_v52  ;;  %v4669_v33 = vld [vmem:[%s5908_s1 + $0x170] sm:$0xff] }
 0x353   :  { %v2312_v34 = vpop.xlane.xlu0 %2311  ;;  %4276 = vmatprep.subr.mxu0 %v5924_v52 }
 0x354   :  { %4631 = vrcp.f32 %v2312_v34 }
 0x356   :  { %4277 = vmatpush3.msra.mxu0 %v4654_v55 }
 0x357   :  { %v2318_v13 = vpop.xlane.xlu0 %2317  ;;  %4460 = vmatprep.subr.bf16.mxu0 %v5922_v3 }
 0x358   :  { %4633 = vrcp.f32 %v2318_v13 }
 0x35a   :  { %v4630_v57 = vpop.eup %4629 }
 0x35b   :  { %v2356_v37 = vmul.f32 %v4630_v57, %v5587_v20  ;;  %v2309_v38 = vpop.xlane.xlu1 %2308  ;;  %v3538_v20 = vrot.slane %v5660_v42, 6 }
 0x35c   :  { %4635 = vrcp.f32 %v2309_v38  ;;  %v2324_v4 = vpop.xlane.xlu0 %2323 }
 0x35d   :  { %4270 = vmatmul.mubr.msk.f32.vlgmr.msra.gmra.mrb[30].mxu1 %vm2366_vm7, %v2356_v37  ;;  %4637 = vrcp.f32 %v2324_v4  ;;  %v3550_v47 = vrot.slane %v2356_v37, 2  ;;  %v3540_v5 = vsel %vm3539_vm9, %v3538_v20, %v5653_v22 }
 0x35e   :  { %v4632_v1 = vpop.eup %4631  ;;  %4459 = vmatpush3.bf16.msra.mxu1 %v5937_v8  ;;  %4287 = vmatprep.mubr.msk.f32.mxu1 %vm4720_vm2, %v5924_v52  ;;  %v3543_v16 = vsel %vm3542_vm10, %v3541_v60, %v3540_v5 }
 0x35f   :  { %v5727_v7 = vmul.f32 %v4632_v1, %v5592_v2  ;;  %4285 = vmatprep.subr.mxu1 %v5924_v52  ;;  %v3544_v2 = vrot.slane %v5690_v63, 4  ;;  %v4663_v63 = vld [vmem:[%s5908_s1 + $0x160] sm:$0xff] }
 0x360   :  { %v2330_v40 = vpop.xlane.xlu0 %2329 }
 0x361   :  { %4639 = vrcp.f32 %v2330_v40  ;;  %v3546_v21 = vsel %vm3545_vm11, %v3544_v2, %v3543_v16 }
 0x362   :  { %4286 = vmatpush3.msra.mxu1 %v4655_v53  ;;  %v4634_v41 = vpop.eup %4633 }
 0x363   :  { %4288 = vmatmul.mubr.msk.f32.vlgmr.msra.gmra.mrb[32].mxu1 %vm2366_vm7, %v5727_v7  ;;  %4463 = vmatprep.subr.bf16.mxu1 %v5922_v3  ;;  %v5755_v14 = vmul.f32 %v4634_v41, %v5596_v9  ;;  %v3549_v9 = vsel %vm3548_vm12, %v3547_v6, %v3546_v21 }
 0x364   :  { %4465 = vmatpush3.bf16.msra.mxu1 %v5938_v18  ;;  %4305 = vmatprep.mubr.msk.f32.mxu1 %vm4720_vm2, %v5924_v52  ;;  %v3552_v54 = vsel %vm3551_vm13, %v3550_v47, %v3549_v9 }
 0x365   :  { %4303 = vmatprep.subr.mxu1 %v5924_v52  ;;  %v3558_v38 = vrot.slane %v5755_v14, 6 }
 0x366   :  { %v4636_v46 = vpop.eup %4635 }
 0x367   :  { %v2357_v10 = vmul.f32 %v4636_v46, %v5601_v51  ;;  %v2315_v62 = vpop.xlane.xlu1 %2314  ;;  %v4638_v51 = vpop.eup %4637 }
 0x368   :  { %4304 = vmatpush3.msra.mxu1 %v4658_v17  ;;  %4641 = vrcp.f32 %v2315_v62  ;;  %v5786_v61 = vmul.f32 %v4638_v51, %v5603_v25 }
 0x369   :  { %v3553_v22 = vrot.slane %v2357_v10, 1  ;;  %4306 = vmatmul.mubr.msk.f32.vlgmr.msra.gmra.mrb[34].mxu1 %vm2366_vm7, %v5755_v14  ;;  %4469 = vmatprep.subr.bf16.mxu1 %v5922_v3 }
 0x36a   :  { %4279 = vmatmul.mubr.msk.f32.vlgmr.msra.gmra.mrb[64].mxu0 %vm2366_vm7, %v2357_v10  ;;  %4471 = vmatpush3.bf16.msra.mxu1 %v4470_v15  ;;  %v3562_v20 = vrot.slane %v5786_v61, 4 }
 0x36b   :  { %4321 = vmatprep.subr.mxu1 %v5924_v52  ;;  %4323 = vmatprep.mubr.msk.f32.mxu1 %vm4720_vm2, %v5924_v52  ;;  %v3555_v42 = vsel %vm3554_vm14, %v3553_v22, %v3552_v54  ;;  %v4640_v43 = vpop.eup %4639 }
 0x36c   :  { %4462 = vmatpush3.bf16.msra.mxu0 %v5939_v0  ;;  %4296 = vmatprep.mubr.msk.f32.mxu0 %vm4720_vm2, %v5924_v52  ;;  %3572 = vst.msk [vmem:[#allocation4] sm:$0xff] %vm2366_vm7, %v3555_v42  ;;  %v2364_v26 = vmul.f32 %v4640_v43, %v5609_v48  ;;  %v4664_v48 = vld [vmem:[%s5908_s1 + $0x118] sm:$0xff] }
 0x36d   :  { %4294 = vmatprep.subr.mxu0 %v5924_v52 }
 0x36e   :  { %4322 = vmatpush3.msra.mxu1 %v4661_v59  ;;  %v3566_v40 = vrot.slane %v2364_v26, 2 }
 0x36f   :  { %4324 = vmatmul.mubr.msk.f32.vlgmr.msra.gmra.mrb[36].mxu1 %vm2366_vm7, %v5786_v61  ;;  %4475 = vmatprep.subr.bf16.mxu1 %v5922_v3 }
 0x370   :  { %4477 = vmatpush3.bf16.msra.mxu1 %v4476_v45  ;;  %4341 = vmatprep.mubr.msk.f32.mxu1 %vm4720_vm2, %v5924_v52 }
 0x371   :  { %4339 = vmatprep.subr.mxu1 %v5924_v52  ;;  %4295 = vmatpush3.msra.mxu0 %v4662_v44 }
 0x372   :  { %v4642_v25 = vpop.eup %4641  ;;  %4466 = vmatprep.subr.bf16.mxu0 %v5922_v3 }
 0x373   :  { %v2359_v27 = vmul.f32 %v4642_v25, %v5614_v56  ;;  %v2321_v28 = vpop.xlane.xlu1 %2320 }
 0x374   :  { %4340 = vmatpush3.msra.mxu1 %v4663_v63  ;;  %4643 = vrcp.f32 %v2321_v28 }
 0x375   :  { %4342 = vmatmul.mubr.msk.f32.vlgmr.msra.gmra.mrb[38].mxu1 %vm2366_vm7, %v2364_v26  ;;  %4297 = vmatmul.mubr.msk.f32.vlgmr.msra.gmra.mrb[66].mxu0 %vm2366_vm7, %v2359_v27  ;;  %v3556_v55 = vrot.slane %v2359_v27, 7 }
 0x376   :  { %4468 = vmatpush3.bf16.msra.mxu0 %v5940_v36  ;;  %4314 = vmatprep.mubr.msk.f32.mxu0 %vm4720_vm2, %v5924_v52 }
 0x377   :  { %4312 = vmatprep.subr.mxu0 %v5924_v52  ;;  %v3557_v37 = vsel %vm3536_vm8, %v3556_v55, %v5727_v7 }
 0x378   :  { %v3559_v4 = vsel %vm3539_vm9, %v3558_v38, %v3557_v37 }
 0x37a   :  { %4313 = vmatpush3.msra.mxu0 %v4664_v48 }
 0x37b   :  { %4472 = vmatprep.subr.bf16.mxu0 %v5922_v3 }
 0x37e   :  { %v4644_v56 = vpop.eup %4643 }
 0x37f   :  { %v2361_v31 = vmul.f32 %v4644_v56, %v5619_v35  ;;  %v2327_v29 = vpop.xlane.xlu1 %2326  ;;  %v4668_v35 = vld [vmem:[%s5908_s1 + $0x168] sm:$0xff] }
 0x380   :  { %4645 = vrcp.f32 %v2327_v29  ;;  %v4479_v34 = vpack.c.bf16 %v4669_v33, %v4668_v35 }
 0x381   :  { %4315 = vmatmul.mubr.msk.f32.vlgmr.msra.gmra.mrb[68].mxu0 %vm2366_vm7, %v2361_v31 }
 0x382   :  { %4474 = vmatpush3.bf16.msra.mxu0 %v4473_v50  ;;  %4332 = vmatprep.mubr.msk.f32.mxu0 %vm4720_vm2, %v5924_v52 }
 0x383   :  { %4330 = vmatprep.subr.mxu0 %v5924_v52 }
 0x386   :  { %4331 = vmatpush3.msra.mxu0 %v4667_v19 }
 0x387   :  { %4478 = vmatprep.subr.bf16.mxu0 %v5922_v3  ;;  %v3560_v3 = vrot.slane %v2361_v31, 5 }
 0x389   :  { %v3561_v8 = vsel %vm3542_vm10, %v3560_v3, %v3559_v4 }
 0x38a   :  { %v4646_v11 = vpop.eup %4645 }
 0x38b   :  { %v2363_v13 = vmul.f32 %v4646_v11, %v5624_v58  ;;  %v2333_v57 = vpop.xlane.xlu1 %2332  ;;  %v4670_v58 = vld [vmem:[%s5908_s1 + $0x178] sm:$0xff]  ;;  %s4723_s1 = smov [#allocation4]  }
 0x38c   :  { %4647 = vrcp.f32 %v2333_v57  ;;  %s3639_s3 = sshll.u32 %s4723_s1, 4  ;;  %s3640_s3 = int_to_ptr.vmem [resolvable:$true] %s3639_s3 }
 0x38d   :  { %4333 = vmatmul.mubr.msk.f32.vlgmr.msra.gmra.mrb[70].mxu0 %vm2366_vm7, %v2363_v13  ;;  %v3564_v1 = vrot.slane %v2363_v13, 3  ;;  %s4671_s9 = scalar_lea.vmem %s3640_s3, 256  ;;  %p4676_p1 = scmp.lt.s32.totalorder %s3640_s3, %s3640_s3 }
 0x38e   :  { %4480 = vmatpush3.bf16.msra.mxu0 %v4479_v34  ;;  %4350 = vmatprep.mubr.msk.f32.mxu0 %vm4720_vm2, %v5924_v52  ;;  %p4672_p0 = scmp.ne.s32.totalorder %s3640_s3, %s4671_s9  ;;  %p4677_p2 = scmp.lt.s32.totalorder %s4671_s9, %s4671_s9 }
 0x38f   :  { %4348 = vmatprep.subr.mxu0 %v5924_v52  ;;  %v3563_v52 = vsel %vm3545_vm11, %v3562_v20, %v3561_v8 }
 0x390   :  { %v3565_v7 = vsel %vm3548_vm12, %v3564_v1, %v3563_v52  ;;  %p4678_p3 = por %p4677_p2, %p4676_p1 }
 0x391   :  { %v3567_v2 = vsel %vm3551_vm13, %v3566_v40, %v3565_v7 }
 0x392   :  { %4349 = vmatpush3.msra.mxu0 %v4670_v58  ;;  %p4679_p4 = pnand %p4678_p3, %p4672_p0 }
 0x396   :  { %v4648_v53 = vpop.eup %4647 }
 0x397   :  { %v2365_v60 = vmul.f32 %v4648_v53, %v5628_v39 }
 0x399   :  { %v3568_v41 = vrot.slane %v2365_v60, 1  ;;  %4351 = vmatmul.mubr.msk.f32.vlgmr.msra.gmra.mrb[72].mxu0 %vm2366_vm7, %v2365_v60 }
 0x39b   :  { %v3569_v18 = vsel %vm3554_vm14, %v3568_v41, %v3567_v2 }
 0x39c   :  { %3573 = vst.msk [vmem:[#allocation4 + $0x8] sm:$0xff] %vm2366_vm7, %v3569_v18 }
 0x3e8   :  { %v2436_v12 = vpop.f32.mrb[56].mxu0 }
 0x3e9   :  { %v4217_v32 = vpop.f32.mrb[57].mxu0 }
 0x3f4   :  { %v2509_v15 = vpop.f32.mrb[58].mxu0 }
 0x3f5   :  { %v3590_v6 = vrot.slane %v2509_v15, 7  ;;  %v4226_v39 = vpop.f32.mrb[59].mxu0 }
 0x3f6   :  { %4682 = shalt.err (!%p4679_p4)
}
 0x3f7   :  { %s4683_s12 = scalar_lea.hbm %s5914_s7, 256 }
 0x3f8   :  { %p4684_p5 = scmp.ne.s32.totalorder %s5914_s7, %s4683_s12  ;;  %p4687_p6 = scmp.lt.u32.totalorder %s4683_s12, %s5914_s7 }
 0x3fa   :  { %p4689_p7 = pnand %p4687_p6, %p4684_p5 }
 0x3fc   :  { %4692 = shalt.err (!%p4689_p7)
}
 0x3fd   :  { %s4724_s17 = smov 128   ;;  %s4725_s4 = smov 8   ;;  %v3591_v46 = vsel %vm3536_vm8, %v3590_v6, %v2436_v12 }
 0x3fe   :  { %3645 = dma.vmem_to_hbm [thread:$0]  %s3640_s3, 256, %s5914_s7, [#allocation5], %s4724_s17, %s4724_s17, %s4725_s4  }
 0x3ff   :  { %s4726_s7 = smov [#allocation2]  }
 0x400   :  { %v2582_v47 = vpop.f32.mrb[26].mxu1  ;;  %s3627_s19 = sshll.u32 %s4726_s7, 4  ;;  %s3628_s19 = int_to_ptr.vmem [resolvable:$true] %s3627_s19 }
 0x401   :  { %v3592_v5 = vrot.slane %v2582_v47, 6  ;;  %v4235_v14 = vpop.f32.mrb[27].mxu1  ;;  %s4693_s20 = scalar_lea.vmem %s3628_s19, 256  ;;  %p4698_p9 = scmp.lt.s32.totalorder %s3628_s19, %s3628_s19 }
 0x402   :  { %p4694_p8 = scmp.ne.s32.totalorder %s3628_s19, %s4693_s20  ;;  %p4699_p10 = scmp.lt.s32.totalorder %s4693_s20, %s4693_s20 }
 0x403   :  { %v3593_v10 = vsel %vm3539_vm9, %v3592_v5, %v3591_v46 }
 0x404   :  { %p4700_p11 = por %p4699_p10, %p4698_p9 }
 0x406   :  { %p4701_p12 = pnand %p4700_p11, %p4694_p8 }
 0x40c   :  { %v2655_v62 = vpop.f32.mrb[60].mxu0 }
 0x40d   :  { %v3594_v16 = vrot.slane %v2655_v62, 5  ;;  %v4244_v17 = vpop.f32.mrb[61].mxu0 }
 0x40f   :  { %v3595_v21 = vsel %vm3542_vm10, %v3594_v16, %v3593_v10 }
 0x418   :  { %v2728_v22 = vpop.f32.mrb[28].mxu1 }
 0x419   :  { %v3596_v9 = vrot.slane %v2728_v22, 4  ;;  %v4253_v51 = vpop.f32.mrb[29].mxu1 }
 0x41b   :  { %v3597_v54 = vsel %vm3545_vm11, %v3596_v9, %v3595_v21 }
 0x424   :  { %v2801_v42 = vpop.f32.mrb[62].mxu0 }
 0x425   :  { %v3598_v23 = vrot.slane %v2801_v42, 3  ;;  %v4262_v24 = vpop.f32.mrb[63].mxu0 }
 0x427   :  { %v3599_v45 = vsel %vm3548_vm12, %v3598_v23, %v3597_v54 }
 0x430   :  { %v2874_v0 = vpop.f32.mrb[30].mxu1 }
 0x431   :  { %v3600_v61 = vrot.slane %v2874_v0, 2  ;;  %v4271_v59 = vpop.f32.mrb[31].mxu1 }
 0x433   :  { %v3601_v43 = vsel %vm3551_vm13, %v3600_v61, %v3599_v45 }
 0x436   :  { %v3020_v44 = vpop.f32.mrb[32].mxu1 }
 0x437   :  { %v4289_v25 = vpop.f32.mrb[33].mxu1 }
 0x43c   :  { %v3166_v26 = vpop.f32.mrb[34].mxu1 }
 0x43d   :  { %v2947_v27 = vpop.f32.mrb[64].mxu0  ;;  %v4307_v28 = vpop.f32.mrb[35].mxu1  ;;  %v3606_v11 = vrot.slane %v3166_v26, 6 }
 0x43e   :  { %v3602_v63 = vrot.slane %v2947_v27, 1  ;;  %v4280_v36 = vpop.f32.mrb[65].mxu0 }
 0x440   :  { %v3603_v48 = vsel %vm3554_vm14, %v3602_v63, %v3601_v43 }
 0x441   :  { %3620 = vst.msk [vmem:[#allocation2] sm:$0xff] %vm543_vm0, %v3603_v48 }
 0x442   :  { %v3312_v56 = vpop.f32.mrb[36].mxu1 }
 0x443   :  { %v4325_v30 = vpop.f32.mrb[37].mxu1  ;;  %v3610_v57 = vrot.slane %v3312_v56, 4 }
 0x448   :  { %v3458_v49 = vpop.f32.mrb[38].mxu1  ;;  %v3093_v50 = vpop.f32.mrb[66].mxu0 }
 0x449   :  { %v3604_v31 = vrot.slane %v3093_v50, 7  ;;  %v4343_v29 = vpop.f32.mrb[39].mxu1  ;;  %v4298_v19 = vpop.f32.mrb[67].mxu0  ;;  %v3614_v1 = vrot.slane %v3458_v49, 2 }
 0x44b   :  { %v3605_v35 = vsel %vm3536_vm8, %v3604_v31, %v3020_v44 }
 0x44c   :  { %v3607_v33 = vsel %vm3539_vm9, %v3606_v11, %v3605_v35 }
 0x454   :  { %v3239_v34 = vpop.f32.mrb[68].mxu0 }
 0x455   :  { %v3608_v55 = vrot.slane %v3239_v34, 5  ;;  %v4316_v13 = vpop.f32.mrb[69].mxu0 }
 0x457   :  { %v3609_v3 = vsel %vm3542_vm10, %v3608_v55, %v3607_v33 }
 0x458   :  { %v3611_v37 = vsel %vm3545_vm11, %v3610_v57, %v3609_v3 }
 0x460   :  { %v3385_v38 = vpop.f32.mrb[70].mxu0 }
 0x461   :  { %v3612_v58 = vrot.slane %v3385_v38, 3  ;;  %v4334_v4 = vpop.f32.mrb[71].mxu0 }
 0x463   :  { %v3613_v8 = vsel %vm3548_vm12, %v3612_v58, %v3611_v37 }
 0x464   :  { %v3615_v20 = vsel %vm3551_vm13, %v3614_v1, %v3613_v8 }
 0x46c   :  { %v3531_v53 = vpop.f32.mrb[72].mxu0 }
 0x46d   :  { %v3616_v52 = vrot.slane %v3531_v53, 1  ;;  %v4352_v60 = vpop.f32.mrb[73].mxu0 }
 0x46f   :  { %v3617_v7 = vsel %vm3554_vm14, %v3616_v52, %v3615_v20 }
 0x470   :  { %3621 = vst.msk [vmem:[#allocation2 + $0x8] sm:$0xff] %vm543_vm0, %v3617_v7 }
 0x471   :  { %4704 = shalt.err (!%p4701_p12)
}
 0x472   :  { %s4705_s2 = scalar_lea.hbm %s5913_s6, 256 }
 0x473   :  { %p4706_p13 = scmp.ne.s32.totalorder %s5913_s6, %s4705_s2  ;;  %p4709_p0 = scmp.lt.u32.totalorder %s4705_s2, %s5913_s6 }
 0x475   :  { %p4711_p1 = pnand %p4709_p0, %p4706_p13 }
 0x477   :  { %4714 = shalt.err (!%p4711_p1)
}
 0x478   :  { %3633 = dma.vmem_to_hbm [thread:$0]  %s3628_s19, 256, %s5913_s6, [#allocation3], %s4724_s17, %s4724_s17, %s4725_s4  }
 0x479   :  { %4715 = dma.done.wait [#allocation3], 256  }
 0x47a   :  { %4716 = vsyncadd [#allocation3], 4294967040 }
 0x47b   :  { %4717 = dma.done.wait [#allocation5], 256  }
 0x47c   :  { %4718 = vsyncadd [#allocation5], 4294967040 }
 0x47d   :  { %3652 = vsyncpa [#allocation3], 1 }
 0x47e   :  { %3653 = vsyncpa [#allocation5], 1 }

</bundles_post_ra>
